<compile_context>
chip_gen: v6e
topology: v6e:2x2x1
jax: 0.10.0
libtpu: 0.0.40
codegen_flags: <defaults>
</compile_context>

<pallas_src>
import functools

import jax
import jax.numpy as jnp
from jax import lax
from jax.experimental import pallas as pl
from jax.experimental.pallas import tpu as pltpu


# ------------------------------ Pallas kernel ------------------------------ #
def _actor_kernel(x_ref, t1_ref, b1_ref, t2_ref, b2_ref, t3_ref, b3_ref,
                  fw1_ref, fb1_ref, fw2_ref, fb2_ref,
                  out_ref, s1_ref, s2_ref, s3_ref, a1_ref, a2_ref, a3_ref,
                  *, geom, batch):
    """Fused conv tower + MLP head. All intermediates stay in VMEM scratch."""

    def conv_rowblock(in_ref, stage_ref, t_ref, bias_ref, act_ref, g):
        B = batch
        Ho = g["Ho"]
        # 1) Gather Ho contiguous row slabs (k input rows each) of the flat
        #    (B, H*W*Cin) NHWC activation into the staging matrix.
        for ho in range(Ho):
            c0 = ho * g["in_stride"]
            stage_ref[ho * B:(ho + 1) * B, :] = in_ref[:, c0:c0 + g["slab"]]
        # 2) One bf16 MXU matmul against the block-Toeplitz weight does the
        #    whole layer (all output rows/cols/channels); f32 accumulation.
        y = jnp.dot(stage_ref[...], t_ref[...],
                    preferred_element_type=jnp.float32)
        y = jnp.maximum(y + bias_ref[...], 0.0).astype(act_ref.dtype)
        # 3) Scatter Ho contiguous row blocks back to the flat NHWC layout.
        for ho in range(Ho):
            o0 = ho * g["out_stride"]
            act_ref[:, o0:o0 + g["out_stride"]] = y[ho * B:(ho + 1) * B, :]

    conv_rowblock(x_ref, s1_ref, t1_ref, b1_ref, a1_ref, geom[0])
    conv_rowblock(a1_ref, s2_ref, t2_ref, b2_ref, a2_ref, geom[1])
    conv_rowblock(a2_ref, s3_ref, t3_ref, b3_ref, a3_ref, geom[2])

    # MLP head: fc1 (ReLU) -> fc2.  a3 is in (h, w, c) flatten order, matching
    # the pre-permuted fc1 weights.  Logits are stored lane-dense (padded to a
    # multiple of 128); the wrapper slices to num_actions.
    h = jnp.dot(a3_ref[...], fw1_ref[...], preferred_element_type=jnp.float32)
    h = jnp.maximum(h + fb1_ref[...], 0.0).astype(jnp.bfloat16)
    logits = jnp.dot(h, fw2_ref[...], preferred_element_type=jnp.float32)
    out_ref[...] = logits + fb2_ref[...]


# ------------------------------ JAX wrapper -------------------------------- #
def _row_toeplitz(wt, stride, W):
    """Expand OIHW conv weights into a (k*W*Cin, Wo*Cout) block-Toeplitz matrix.

    Row index (i, w, ci), column index (wo, co):
      T[(i,w,ci),(wo,co)] = W[i, w - wo*stride, ci, co] if 0 <= w-wo*stride < k.
    Multiplying a flattened k-row NHWC input slab by T performs the full
    width-direction convolution for one output row.
    """
    cout, cin, k, _ = wt.shape
    Wo = (W - k) // stride + 1
    w_hwio = jnp.transpose(wt, (2, 3, 1, 0))          # (k, k, Cin, Cout)
    T = jnp.zeros((k, W, cin, Wo, cout), jnp.float32)
    for wo in range(Wo):
        T = T.at[:, wo * stride:wo * stride + k, :, wo, :].set(w_hwio)
    return T.reshape(k * W * cin, Wo * cout)


def prepare_params(params, in_channels, spatial, num_actions):
    """One-time transform of PyTorch-layout params into kernel-ready operands."""
    h = w = spatial
    c = in_channels
    conv_t, conv_b, geoms = [], [], []
    for (wt, b, s) in params["conv"]:
        cout, cin, k, _ = wt.shape
        assert cin == c
        ho = (h - k) // s + 1
        wo = (w - k) // s + 1
        conv_t.append(_row_toeplitz(wt, s, w).astype(jnp.bfloat16))
        conv_b.append(jnp.tile(b.reshape(1, cout).astype(jnp.float32), (1, wo)))
        geoms.append(dict(Ho=ho,
                          slab=k * w * cin,          # k input rows, flat NHWC
                          in_stride=s * w * cin,     # lane offset per output row
                          out_stride=wo * cout,      # flat output cols per row
                          out_size=ho * wo * cout))
        h, w, c = ho, wo, cout
    H3, W3, C3 = h, w, c

    hidden = params["fc1_w"].shape[1]
    # Fold PyTorch's NCHW (c, h, w) flatten order into fc1 so the kernel can
    # consume the NHWC (h, w, c) feature layout directly.
    fw1 = (params["fc1_w"].reshape(C3, H3, W3, hidden)
           .transpose(1, 2, 0, 3).reshape(H3 * W3 * C3, hidden))
    fb1 = params["fc1_b"].reshape(1, hidden).astype(jnp.float32)

    # Lane-dense logits: pad num_actions up to a multiple of 128.
    n_pad = ((num_actions + 127) // 128) * 128
    fw2 = jnp.zeros((hidden, n_pad), jnp.float32).at[:, :num_actions].set(
        params["fc2_w"])
    fb2 = jnp.zeros((1, n_pad), jnp.float32).at[:, :num_actions].set(
        params["fc2_b"])

    return {
        "conv_t": conv_t, "conv_b": conv_b, "geom": tuple(geoms),
        "in_size": spatial * spatial * in_channels,
        "fc1_w": fw1.astype(jnp.bfloat16), "fc1_b": fb1,
        "fc2_w": fw2.astype(jnp.bfloat16), "fc2_b": fb2,
        "num_actions": int(num_actions), "n_pad": int(n_pad),
    }


def atari_actor_forward(kp, x_nchw):
    B, Cin, H, W = x_nchw.shape
    geoms = kp["geom"]
    assert H * W * Cin == kp["in_size"], (x_nchw.shape, kp["in_size"])

    # NCHW -> NHWC -> flat (B, H*W*C); bf16 halves operand DMA bytes.
    x = jnp.transpose(x_nchw, (0, 2, 3, 1)).reshape(B, H * W * Cin)
    x = x.astype(jnp.bfloat16)

    vmem = pl.BlockSpec(memory_space=pltpu.MemorySpace.VMEM)
    kernel = functools.partial(_actor_kernel, geom=geoms, batch=B)

    scratch = ([pltpu.VMEM((g["Ho"] * B, g["slab"]), jnp.bfloat16)   # stages
                for g in geoms]
               + [pltpu.VMEM((B, g["out_size"]), jnp.bfloat16)       # acts
                  for g in geoms])

    logits_pad = pl.pallas_call(
        kernel,
        out_shape=jax.ShapeDtypeStruct((B, kp["n_pad"]), jnp.float32),
        in_specs=[vmem] * 11,
        out_specs=vmem,
        scratch_shapes=scratch,
    )(x,
      kp["conv_t"][0], kp["conv_b"][0],
      kp["conv_t"][1], kp["conv_b"][1],
      kp["conv_t"][2], kp["conv_b"][2],
      kp["fc1_w"], kp["fc1_b"], kp["fc2_w"], kp["fc2_b"])

    # TODO(synk): Categorical sampling (action_dist/act) is torch.distributions
    # glue, not part of forward(); logits are returned.
    return logits_pad[:, :kp["num_actions"]]


def reference_forward(params, x_nchw):
    # Pure-JAX f32 reference (XLA conv) used only to sanity-check the kernel.
    x = x_nchw.astype(jnp.float32)
    for (w, b, stride) in params["conv"]:
        x = lax.conv_general_dilated(
            x, w, (stride, stride), "VALID",
            dimension_numbers=("NCHW", "OIHW", "NCHW"))
        x = jax.nn.relu(x + b.reshape(1, -1, 1, 1))
    B = x.shape[0]
    feat = x.reshape(B, -1)
    h = jax.nn.relu(feat @ params["fc1_w"] + params["fc1_b"])
    return h @ params["fc2_w"] + params["fc2_b"]


# ------------------------------ params setup ------------------------------- #
def init_params(key, in_channels, spatial, num_actions, hidden=128):
    conv_cfg = [(in_channels, 32, 8, 4), (32, 64, 4, 2), (64, 64, 3, 1)]
    keys = jax.random.split(key, 2 * len(conv_cfg) + 4)
    ki = iter(range(len(keys)))

    conv_params = []
    hw = spatial
    for (cin, cout, k, s) in conv_cfg:
        fan_in = cin * k * k
        w = jax.random.normal(keys[next(ki)], (cout, cin, k, k),
                              jnp.float32) * jnp.sqrt(2.0 / fan_in)
        b = 0.01 * jax.random.normal(keys[next(ki)], (cout,), jnp.float32)
        conv_params.append((w, b, s))
        hw = (hw - k) // s + 1

    output_dim = 64 * hw * hw
    fc1_w = jax.random.normal(keys[next(ki)], (output_dim, hidden),
                              jnp.float32) * jnp.sqrt(2.0 / output_dim)
    fc1_b = 0.01 * jax.random.normal(keys[next(ki)], (hidden,), jnp.float32)
    fc2_w = jax.random.normal(keys[next(ki)], (hidden, num_actions),
                              jnp.float32) * jnp.sqrt(1.0 / hidden)
    fc2_b = 0.01 * jax.random.normal(keys[next(ki)], (num_actions,), jnp.float32)

    return {"conv": conv_params, "fc1_w": fc1_w, "fc1_b": fc1_b,
            "fc2_w": fc2_w, "fc2_b": fc2_b}, output_dim


if __name__ == "__main__":
    key = jax.random.PRNGKey(0)
    k_param, k_x = jax.random.split(key)

    # 36 is the smallest valid HxW for the Nature-DQN conv stack.
    batch, channels, spatial, num_actions = 2, 4, 36, 6
    params, output_dim = init_params(k_param, channels, spatial, num_actions)
    kparams = prepare_params(params, channels, spatial, num_actions)

    x = jax.random.uniform(k_x, (batch, channels, spatial, spatial), jnp.float32)

    logits = jax.block_until_ready(atari_actor_forward(kparams, x))
    assert logits.shape == (batch, num_actions), logits.shape

    ref = jax.block_until_ready(reference_forward(params, x))
    # bf16 MXU operands with f32 accumulation -> loosened tolerance vs f32 ref.
    max_err = float(jnp.max(jnp.abs(logits - ref)))
    assert jnp.allclose(logits, ref, rtol=6e-2, atol=6e-2), max_err

    print("KERNEL_OK")
</pallas_src>

<mosaic_0001>
module attributes {stable_mosaic.version = 11 : i64} {
  func.func @_actor_kernel(%arg0: memref<2x5184xbf16, #tpu.memory_space<vmem>>, %arg1: memref<1152x256xbf16, #tpu.memory_space<vmem>>, %arg2: memref<1x256xf32, #tpu.memory_space<vmem>>, %arg3: memref<1024x192xbf16, #tpu.memory_space<vmem>>, %arg4: memref<1x192xf32, #tpu.memory_space<vmem>>, %arg5: memref<576x64xbf16, #tpu.memory_space<vmem>>, %arg6: memref<1x64xf32, #tpu.memory_space<vmem>>, %arg7: memref<64x128xbf16, #tpu.memory_space<vmem>>, %arg8: memref<1x128xf32, #tpu.memory_space<vmem>>, %arg9: memref<128x128xbf16, #tpu.memory_space<vmem>>, %arg10: memref<1x128xf32, #tpu.memory_space<vmem>>, %arg11: memref<2x128xf32, #tpu.memory_space<vmem>>, %arg12: memref<16x1152xbf16, #tpu.memory_space<vmem>>, %arg13: memref<6x1024xbf16, #tpu.memory_space<vmem>>, %arg14: memref<2x576xbf16, #tpu.memory_space<vmem>>, %arg15: memref<2x2048xbf16, #tpu.memory_space<vmem>>, %arg16: memref<2x576xbf16, #tpu.memory_space<vmem>>, %arg17: memref<2x64xbf16, #tpu.memory_space<vmem>>) attributes {dimension_semantics = [], scalar_prefetch = 0 : i64, scratch_operands = 6 : i64, tpu.core_type = #tpu.core_type<tc>} {
    %c0 = arith.constant 0 : index
    %c0_0 = arith.constant 0 : index
    %0 = vector.load %arg0[%c0, %c0_0] : memref<2x5184xbf16, #tpu.memory_space<vmem>>, vector<2x1152xbf16>
    %c0_1 = arith.constant 0 : index
    %c0_2 = arith.constant 0 : index
    %1 = vector.load %arg12[%c0_1, %c0_2] : memref<16x1152xbf16, #tpu.memory_space<vmem>>, vector<2x1152xbf16>
    tpu.vector_store %arg12[%c0_1, %c0_2], %0 {strides = array<i32>} : memref<16x1152xbf16, #tpu.memory_space<vmem>>, vector<2x1152xbf16>,
    %c0_3 = arith.constant 0 : index
    %c576 = arith.constant 576 : index
    %2 = vector.load %arg0[%c0_3, %c576] : memref<2x5184xbf16, #tpu.memory_space<vmem>>, vector<2x1152xbf16>
    %c2 = arith.constant 2 : index
    %c0_4 = arith.constant 0 : index
    %3 = vector.load %arg12[%c2, %c0_4] : memref<16x1152xbf16, #tpu.memory_space<vmem>>, vector<2x1152xbf16>
    tpu.vector_store %arg12[%c2, %c0_4], %2 {strides = array<i32>} : memref<16x1152xbf16, #tpu.memory_space<vmem>>, vector<2x1152xbf16>,
    %c0_5 = arith.constant 0 : index
    %c1152 = arith.constant 1152 : index
    %4 = vector.load %arg0[%c0_5, %c1152] : memref<2x5184xbf16, #tpu.memory_space<vmem>>, vector<2x1152xbf16>
    %c4 = arith.constant 4 : index
    %c0_6 = arith.constant 0 : index
    %5 = vector.load %arg12[%c4, %c0_6] : memref<16x1152xbf16, #tpu.memory_space<vmem>>, vector<2x1152xbf16>
    tpu.vector_store %arg12[%c4, %c0_6], %4 {strides = array<i32>} : memref<16x1152xbf16, #tpu.memory_space<vmem>>, vector<2x1152xbf16>,
    %c0_7 = arith.constant 0 : index
    %c1728 = arith.constant 1728 : index
    %6 = vector.load %arg0[%c0_7, %c1728] : memref<2x5184xbf16, #tpu.memory_space<vmem>>, vector<2x1152xbf16>
    %c6 = arith.constant 6 : index
    %c0_8 = arith.constant 0 : index
    %7 = vector.load %arg12[%c6, %c0_8] : memref<16x1152xbf16, #tpu.memory_space<vmem>>, vector<2x1152xbf16>
    tpu.vector_store %arg12[%c6, %c0_8], %6 {strides = array<i32>} : memref<16x1152xbf16, #tpu.memory_space<vmem>>, vector<2x1152xbf16>,
    %c0_9 = arith.constant 0 : index
    %c2304 = arith.constant 2304 : index
    %8 = vector.load %arg0[%c0_9, %c2304] : memref<2x5184xbf16, #tpu.memory_space<vmem>>, vector<2x1152xbf16>
    %c8 = arith.constant 8 : index
    %c0_10 = arith.constant 0 : index
    %9 = vector.load %arg12[%c8, %c0_10] : memref<16x1152xbf16, #tpu.memory_space<vmem>>, vector<2x1152xbf16>
    tpu.vector_store %arg12[%c8, %c0_10], %8 {strides = array<i32>} : memref<16x1152xbf16, #tpu.memory_space<vmem>>, vector<2x1152xbf16>,
    %c0_11 = arith.constant 0 : index
    %c2880 = arith.constant 2880 : index
    %10 = vector.load %arg0[%c0_11, %c2880] : memref<2x5184xbf16, #tpu.memory_space<vmem>>, vector<2x1152xbf16>
    %c10 = arith.constant 10 : index
    %c0_12 = arith.constant 0 : index
    %11 = vector.load %arg12[%c10, %c0_12] : memref<16x1152xbf16, #tpu.memory_space<vmem>>, vector<2x1152xbf16>
    tpu.vector_store %arg12[%c10, %c0_12], %10 {strides = array<i32>} : memref<16x1152xbf16, #tpu.memory_space<vmem>>, vector<2x1152xbf16>,
    %c0_13 = arith.constant 0 : index
    %c3456 = arith.constant 3456 : index
    %12 = vector.load %arg0[%c0_13, %c3456] : memref<2x5184xbf16, #tpu.memory_space<vmem>>, vector<2x1152xbf16>
    %c12 = arith.constant 12 : index
    %c0_14 = arith.constant 0 : index
    %13 = vector.load %arg12[%c12, %c0_14] : memref<16x1152xbf16, #tpu.memory_space<vmem>>, vector<2x1152xbf16>
    tpu.vector_store %arg12[%c12, %c0_14], %12 {strides = array<i32>} : memref<16x1152xbf16, #tpu.memory_space<vmem>>, vector<2x1152xbf16>,
    %c0_15 = arith.constant 0 : index
    %c4032 = arith.constant 4032 : index
    %14 = vector.load %arg0[%c0_15, %c4032] : memref<2x5184xbf16, #tpu.memory_space<vmem>>, vector<2x1152xbf16>
    %c14 = arith.constant 14 : index
    %c0_16 = arith.constant 0 : index
    %15 = vector.load %arg12[%c14, %c0_16] : memref<16x1152xbf16, #tpu.memory_space<vmem>>, vector<2x1152xbf16>
    tpu.vector_store %arg12[%c14, %c0_16], %14 {strides = array<i32>} : memref<16x1152xbf16, #tpu.memory_space<vmem>>, vector<2x1152xbf16>,
    %c0_17 = arith.constant 0 : index
    %c0_18 = arith.constant 0 : index
    %16 = vector.load %arg12[%c0_17, %c0_18] : memref<16x1152xbf16, #tpu.memory_space<vmem>>, vector<16x1152xbf16>
    %c0_19 = arith.constant 0 : index
    %c0_20 = arith.constant 0 : index
    %17 = vector.load %arg1[%c0_19, %c0_20] : memref<1152x256xbf16, #tpu.memory_space<vmem>>, vector<1152x256xbf16>
    %cst = arith.constant dense<0.000000e+00> : vector<16x256xf32>
    %18 = tpu.matmul %16, %17, %cst {dimension_numbers = #tpu.dot_dimension_numbers<[1], [0], [0], [1], [0, 0, 1, 1], [], []>} : vector<16x1152xbf16>, vector<1152x256xbf16>, vector<16x256xf32> -> vector<16x256xf32>
    %c0_21 = arith.constant 0 : index
    %c0_22 = arith.constant 0 : index
    %19 = vector.load %arg2[%c0_21, %c0_22] : memref<1x256xf32, #tpu.memory_space<vmem>>, vector<1x256xf32>
    %20 = vector.broadcast %19 : vector<1x256xf32> to vector<16x256xf32>
    %21 = arith.addf %18, %20 : vector<16x256xf32>
    %cst_23 = arith.constant 0.000000e+00 : f32
    %22 = vector.broadcast %cst_23 : f32 to vector<16x256xf32>
    %23 = arith.maximumf %21, %22 : vector<16x256xf32>
    %24 = arith.truncf %23 : vector<16x256xf32> to vector<16x256xbf16>
    %25 = vector.extract_strided_slice %24 {offsets = [0, 0], sizes = [2, 256], strides = [1, 1]} : vector<16x256xbf16> to vector<2x256xbf16>
    %c0_24 = arith.constant 0 : index
    %c0_25 = arith.constant 0 : index
    %26 = vector.load %arg15[%c0_24, %c0_25] : memref<2x2048xbf16, #tpu.memory_space<vmem>>, vector<2x256xbf16>
    tpu.vector_store %arg15[%c0_24, %c0_25], %25 {strides = array<i32>} : memref<2x2048xbf16, #tpu.memory_space<vmem>>, vector<2x256xbf16>,
    %27 = vector.extract_strided_slice %24 {offsets = [2, 0], sizes = [2, 256], strides = [1, 1]} : vector<16x256xbf16> to vector<2x256xbf16>
    %c0_26 = arith.constant 0 : index
    %c256 = arith.constant 256 : index
    %28 = vector.load %arg15[%c0_26, %c256] : memref<2x2048xbf16, #tpu.memory_space<vmem>>, vector<2x256xbf16>
    tpu.vector_store %arg15[%c0_26, %c256], %27 {strides = array<i32>} : memref<2x2048xbf16, #tpu.memory_space<vmem>>, vector<2x256xbf16>,
    %29 = vector.extract_strided_slice %24 {offsets = [4, 0], sizes = [2, 256], strides = [1, 1]} : vector<16x256xbf16> to vector<2x256xbf16>
    %c0_27 = arith.constant 0 : index
    %c512 = arith.constant 512 : index
    %30 = vector.load %arg15[%c0_27, %c512] : memref<2x2048xbf16, #tpu.memory_space<vmem>>, vector<2x256xbf16>
    tpu.vector_store %arg15[%c0_27, %c512], %29 {strides = array<i32>} : memref<2x2048xbf16, #tpu.memory_space<vmem>>, vector<2x256xbf16>,
    %31 = vector.extract_strided_slice %24 {offsets = [6, 0], sizes = [2, 256], strides = [1, 1]} : vector<16x256xbf16> to vector<2x256xbf16>
    %c0_28 = arith.constant 0 : index
    %c768 = arith.constant 768 : index
    %32 = vector.load %arg15[%c0_28, %c768] : memref<2x2048xbf16, #tpu.memory_space<vmem>>, vector<2x256xbf16>
    tpu.vector_store %arg15[%c0_28, %c768], %31 {strides = array<i32>} : memref<2x2048xbf16, #tpu.memory_space<vmem>>, vector<2x256xbf16>,
    %33 = vector.extract_strided_slice %24 {offsets = [8, 0], sizes = [2, 256], strides = [1, 1]} : vector<16x256xbf16> to vector<2x256xbf16>
    %c0_29 = arith.constant 0 : index
    %c1024 = arith.constant 1024 : index
    %34 = vector.load %arg15[%c0_29, %c1024] : memref<2x2048xbf16, #tpu.memory_space<vmem>>, vector<2x256xbf16>
    tpu.vector_store %arg15[%c0_29, %c1024], %33 {strides = array<i32>} : memref<2x2048xbf16, #tpu.memory_space<vmem>>, vector<2x256xbf16>,
    %35 = vector.extract_strided_slice %24 {offsets = [10, 0], sizes = [2, 256], strides = [1, 1]} : vector<16x256xbf16> to vector<2x256xbf16>
    %c0_30 = arith.constant 0 : index
    %c1280 = arith.constant 1280 : index
    %36 = vector.load %arg15[%c0_30, %c1280] : memref<2x2048xbf16, #tpu.memory_space<vmem>>, vector<2x256xbf16>
    tpu.vector_store %arg15[%c0_30, %c1280], %35 {strides = array<i32>} : memref<2x2048xbf16, #tpu.memory_space<vmem>>, vector<2x256xbf16>,
    %37 = vector.extract_strided_slice %24 {offsets = [12, 0], sizes = [2, 256], strides = [1, 1]} : vector<16x256xbf16> to vector<2x256xbf16>
    %c0_31 = arith.constant 0 : index
    %c1536 = arith.constant 1536 : index
    %38 = vector.load %arg15[%c0_31, %c1536] : memref<2x2048xbf16, #tpu.memory_space<vmem>>, vector<2x256xbf16>
    tpu.vector_store %arg15[%c0_31, %c1536], %37 {strides = array<i32>} : memref<2x2048xbf16, #tpu.memory_space<vmem>>, vector<2x256xbf16>,
    %39 = vector.extract_strided_slice %24 {offsets = [14, 0], sizes = [2, 256], strides = [1, 1]} : vector<16x256xbf16> to vector<2x256xbf16>
    %c0_32 = arith.constant 0 : index
    %c1792 = arith.constant 1792 : index
    %40 = vector.load %arg15[%c0_32, %c1792] : memref<2x2048xbf16, #tpu.memory_space<vmem>>, vector<2x256xbf16>
    tpu.vector_store %arg15[%c0_32, %c1792], %39 {strides = array<i32>} : memref<2x2048xbf16, #tpu.memory_space<vmem>>, vector<2x256xbf16>,
    %c0_33 = arith.constant 0 : index
    %c0_34 = arith.constant 0 : index
    %41 = vector.load %arg15[%c0_33, %c0_34] : memref<2x2048xbf16, #tpu.memory_space<vmem>>, vector<2x1024xbf16>
    %c0_35 = arith.constant 0 : index
    %c0_36 = arith.constant 0 : index
    %42 = vector.load %arg13[%c0_35, %c0_36] : memref<6x1024xbf16, #tpu.memory_space<vmem>>, vector<2x1024xbf16>
    tpu.vector_store %arg13[%c0_35, %c0_36], %41 {strides = array<i32>} : memref<6x1024xbf16, #tpu.memory_space<vmem>>, vector<2x1024xbf16>,
    %c0_37 = arith.constant 0 : index
    %c512_38 = arith.constant 512 : index
    %43 = vector.load %arg15[%c0_37, %c512_38] : memref<2x2048xbf16, #tpu.memory_space<vmem>>, vector<2x1024xbf16>
    %c2_39 = arith.constant 2 : index
    %c0_40 = arith.constant 0 : index
    %44 = vector.load %arg13[%c2_39, %c0_40] : memref<6x1024xbf16, #tpu.memory_space<vmem>>, vector<2x1024xbf16>
    tpu.vector_store %arg13[%c2_39, %c0_40], %43 {strides = array<i32>} : memref<6x1024xbf16, #tpu.memory_space<vmem>>, vector<2x1024xbf16>,
    %c0_41 = arith.constant 0 : index
    %c1024_42 = arith.constant 1024 : index
    %45 = vector.load %arg15[%c0_41, %c1024_42] : memref<2x2048xbf16, #tpu.memory_space<vmem>>, vector<2x1024xbf16>
    %c4_43 = arith.constant 4 : index
    %c0_44 = arith.constant 0 : index
    %46 = vector.load %arg13[%c4_43, %c0_44] : memref<6x1024xbf16, #tpu.memory_space<vmem>>, vector<2x1024xbf16>
    tpu.vector_store %arg13[%c4_43, %c0_44], %45 {strides = array<i32>} : memref<6x1024xbf16, #tpu.memory_space<vmem>>, vector<2x1024xbf16>,
    %c0_45 = arith.constant 0 : index
    %c0_46 = arith.constant 0 : index
    %47 = vector.load %arg13[%c0_45, %c0_46] : memref<6x1024xbf16, #tpu.memory_space<vmem>>, vector<6x1024xbf16>
    %c0_47 = arith.constant 0 : index
    %c0_48 = arith.constant 0 : index
    %48 = vector.load %arg3[%c0_47, %c0_48] : memref<1024x192xbf16, #tpu.memory_space<vmem>>, vector<1024x192xbf16>
    %cst_49 = arith.constant dense<0.000000e+00> : vector<6x192xf32>
    %49 = tpu.matmul %47, %48, %cst_49 {dimension_numbers = #tpu.dot_dimension_numbers<[1], [0], [0], [1], [0, 0, 1, 1], [], []>} : vector<6x1024xbf16>, vector<1024x192xbf16>, vector<6x192xf32> -> vector<6x192xf32>
    %c0_50 = arith.constant 0 : index
    %c0_51 = arith.constant 0 : index
    %50 = vector.load %arg4[%c0_50, %c0_51] : memref<1x192xf32, #tpu.memory_space<vmem>>, vector<1x192xf32>
    %51 = vector.broadcast %50 : vector<1x192xf32> to vector<6x192xf32>
    %52 = arith.addf %49, %51 : vector<6x192xf32>
    %cst_52 = arith.constant 0.000000e+00 : f32
    %53 = vector.broadcast %cst_52 : f32 to vector<6x192xf32>
    %54 = arith.maximumf %52, %53 : vector<6x192xf32>
    %55 = arith.truncf %54 : vector<6x192xf32> to vector<6x192xbf16>
    %56 = vector.extract_strided_slice %55 {offsets = [0, 0], sizes = [2, 192], strides = [1, 1]} : vector<6x192xbf16> to vector<2x192xbf16>
    %c0_53 = arith.constant 0 : index
    %c0_54 = arith.constant 0 : index
    %57 = vector.load %arg16[%c0_53, %c0_54] : memref<2x576xbf16, #tpu.memory_space<vmem>>, vector<2x192xbf16>
    tpu.vector_store %arg16[%c0_53, %c0_54], %56 {strides = array<i32>} : memref<2x576xbf16, #tpu.memory_space<vmem>>, vector<2x192xbf16>,
    %58 = vector.extract_strided_slice %55 {offsets = [2, 0], sizes = [2, 192], strides = [1, 1]} : vector<6x192xbf16> to vector<2x192xbf16>
    %c0_55 = arith.constant 0 : index
    %c192 = arith.constant 192 : index
    %59 = vector.load %arg16[%c0_55, %c192] : memref<2x576xbf16, #tpu.memory_space<vmem>>, vector<2x192xbf16>
    tpu.vector_store %arg16[%c0_55, %c192], %58 {strides = array<i32>} : memref<2x576xbf16, #tpu.memory_space<vmem>>, vector<2x192xbf16>,
    %60 = vector.extract_strided_slice %55 {offsets = [4, 0], sizes = [2, 192], strides = [1, 1]} : vector<6x192xbf16> to vector<2x192xbf16>
    %c0_56 = arith.constant 0 : index
    %c384 = arith.constant 384 : index
    %61 = vector.load %arg16[%c0_56, %c384] : memref<2x576xbf16, #tpu.memory_space<vmem>>, vector<2x192xbf16>
    tpu.vector_store %arg16[%c0_56, %c384], %60 {strides = array<i32>} : memref<2x576xbf16, #tpu.memory_space<vmem>>, vector<2x192xbf16>,
    %c0_57 = arith.constant 0 : index
    %c0_58 = arith.constant 0 : index
    %62 = vector.load %arg16[%c0_57, %c0_58] : memref<2x576xbf16, #tpu.memory_space<vmem>>, vector<2x576xbf16>
    %c0_59 = arith.constant 0 : index
    %c0_60 = arith.constant 0 : index
    %63 = vector.load %arg14[%c0_59, %c0_60] : memref<2x576xbf16, #tpu.memory_space<vmem>>, vector<2x576xbf16>
    tpu.vector_store %arg14[%c0_59, %c0_60], %62 {strides = array<i32>} : memref<2x576xbf16, #tpu.memory_space<vmem>>, vector<2x576xbf16>,
    %c0_61 = arith.constant 0 : index
    %c0_62 = arith.constant 0 : index
    %64 = vector.load %arg14[%c0_61, %c0_62] : memref<2x576xbf16, #tpu.memory_space<vmem>>, vector<2x576xbf16>
    %c0_63 = arith.constant 0 : index
    %c0_64 = arith.constant 0 : index
    %65 = vector.load %arg5[%c0_63, %c0_64] : memref<576x64xbf16, #tpu.memory_space<vmem>>, vector<576x64xbf16>
    %cst_65 = arith.constant dense<0.000000e+00> : vector<2x64xf32>
    %66 = tpu.matmul %64, %65, %cst_65 {dimension_numbers = #tpu.dot_dimension_numbers<[1], [0], [0], [1], [0, 0, 1, 1], [], []>} : vector<2x576xbf16>, vector<576x64xbf16>, vector<2x64xf32> -> vector<2x64xf32>
    %c0_66 = arith.constant 0 : index
    %c0_67 = arith.constant 0 : index
    %67 = vector.load %arg6[%c0_66, %c0_67] : memref<1x64xf32, #tpu.memory_space<vmem>>, vector<1x64xf32>
    %68 = vector.broadcast %67 : vector<1x64xf32> to vector<2x64xf32>
    %69 = arith.addf %66, %68 : vector<2x64xf32>
    %cst_68 = arith.constant 0.000000e+00 : f32
    %70 = vector.broadcast %cst_68 : f32 to vector<2x64xf32>
    %71 = arith.maximumf %69, %70 : vector<2x64xf32>
    %72 = arith.truncf %71 : vector<2x64xf32> to vector<2x64xbf16>
    %c0_69 = arith.constant 0 : index
    %c0_70 = arith.constant 0 : index
    %73 = vector.load %arg17[%c0_69, %c0_70] : memref<2x64xbf16, #tpu.memory_space<vmem>>, vector<2x64xbf16>
    tpu.vector_store %arg17[%c0_69, %c0_70], %72 {strides = array<i32>} : memref<2x64xbf16, #tpu.memory_space<vmem>>, vector<2x64xbf16>,
    %c0_71 = arith.constant 0 : index
    %c0_72 = arith.constant 0 : index
    %74 = vector.load %arg17[%c0_71, %c0_72] : memref<2x64xbf16, #tpu.memory_space<vmem>>, vector<2x64xbf16>
    %c0_73 = arith.constant 0 : index
    %c0_74 = arith.constant 0 : index
    %75 = vector.load %arg7[%c0_73, %c0_74] : memref<64x128xbf16, #tpu.memory_space<vmem>>, vector<64x128xbf16>
    %cst_75 = arith.constant dense<0.000000e+00> : vector<2x128xf32>
    %76 = tpu.matmul %74, %75, %cst_75 {dimension_numbers = #tpu.dot_dimension_numbers<[1], [0], [0], [1], [0, 0, 1, 1], [], []>} : vector<2x64xbf16>, vector<64x128xbf16>, vector<2x128xf32> -> vector<2x128xf32>
    %c0_76 = arith.constant 0 : index
    %c0_77 = arith.constant 0 : index
    %77 = vector.load %arg8[%c0_76, %c0_77] : memref<1x128xf32, #tpu.memory_space<vmem>>, vector<1x128xf32>
    %78 = vector.broadcast %77 : vector<1x128xf32> to vector<2x128xf32>
    %79 = arith.addf %76, %78 : vector<2x128xf32>
    %cst_78 = arith.constant 0.000000e+00 : f32
    %80 = vector.broadcast %cst_78 : f32 to vector<2x128xf32>
    %81 = arith.maximumf %79, %80 : vector<2x128xf32>
    %82 = arith.truncf %81 : vector<2x128xf32> to vector<2x128xbf16>
    %c0_79 = arith.constant 0 : index
    %c0_80 = arith.constant 0 : index
    %83 = vector.load %arg9[%c0_79, %c0_80] : memref<128x128xbf16, #tpu.memory_space<vmem>>, vector<128x128xbf16>
    %cst_81 = arith.constant dense<0.000000e+00> : vector<2x128xf32>
    %84 = tpu.matmul %82, %83, %cst_81 {dimension_numbers = #tpu.dot_dimension_numbers<[1], [0], [0], [1], [0, 0, 1, 1], [], []>} : vector<2x128xbf16>, vector<128x128xbf16>, vector<2x128xf32> -> vector<2x128xf32>
    %c0_82 = arith.constant 0 : index
    %c0_83 = arith.constant 0 : index
    %85 = vector.load %arg10[%c0_82, %c0_83] : memref<1x128xf32, #tpu.memory_space<vmem>>, vector<1x128xf32>
    %86 = vector.broadcast %85 : vector<1x128xf32> to vector<2x128xf32>
    %87 = arith.addf %84, %86 : vector<2x128xf32>
    %c0_84 = arith.constant 0 : index
    %c0_85 = arith.constant 0 : index
    %88 = vector.load %arg11[%c0_84, %c0_85] : memref<2x128xf32, #tpu.memory_space<vmem>>, vector<2x128xf32>
    tpu.vector_store %arg11[%c0_84, %c0_85], %87 {strides = array<i32>} : memref<2x128xf32, #tpu.memory_space<vmem>>, vector<2x128xf32>,
    return
  }
}

</mosaic_0001>

<bundles_post_ra>
// kernel: tpu_custom_call.1
= control target key start
LH: loop header
LB: loop body
LE: loop exit
PB: predicated region body
PF: predicated region fallthrough
CT: control target
= control target key end

     0   :  { %v48_v0 = vlaneseq  ;;  %v4837_v2 = vmov 1935823168   ;;  %s4838_s20 = smov 64   ;;  %vm192_vm0 = vcmask 1043456   ;;  %vm194_vm1 = vcmask 523264   ;;  %s6139_s0 = inlined_call_operand.vmem [shape: bf16[2,5184], index: 0, kind: input, shape index: {}]   ;;  %s6140_s1 = inlined_call_operand.vmem [shape: bf16[1152,256], index: 1, kind: input, shape index: {}]   ;;  %s6141_s2 = inlined_call_operand.vmem [shape: f32[1,256], index: 2, kind: input, shape index: {}]   ;;  %s6142_s3 = inlined_call_operand.vmem [shape: bf16[1024,192], index: 3, kind: input, shape index: {}]   ;;  %s6143_s4 = inlined_call_operand.vmem [shape: f32[1,192], index: 4, kind: input, shape index: {}]   ;;  %s6144_s5 = inlined_call_operand.vmem [shape: bf16[576,64], index: 5, kind: input, shape index: {}]   ;;  %s6145_s6 = inlined_call_operand.vmem [shape: f32[1,64], index: 6, kind: input, shape index: {}]   ;;  %s6146_s7 = inlined_call_operand.vmem [shape: bf16[64,128], index: 7, kind: input, shape index: {}]   ;;  %s6147_s8 = inlined_call_operand.vmem [shape: f32[1,128], index: 8, kind: input, shape index: {}]   ;;  %s6148_s9 = inlined_call_operand.vmem [shape: bf16[128,128], index: 9, kind: input, shape index: {}]   ;;  %s6149_s10 = inlined_call_operand.vmem [shape: f32[1,128], index: 10, kind: input, shape index: {}]   ;;  %s6150_s11 = inlined_call_operand.hbm [shape: f32[2,128], index: 11, kind: output, shape index: {}]  }
   0x1   :  { %v287_v1 = vld [vmem:[%s6139_s0 + $0xd] sm:$0xff]  ;;  %v46_v3 = vunpack.c.l.s4 %v4837_v2  ;;  %v631_v7 = vld [vmem:[%s6139_s0 + $0x1f] sm:$0xff]  ;;  %v459_v9 = vld [vmem:[%s6139_s0 + $0x16] sm:$0xff] }
   0x2   :  { %v4907_v4 = vshrl.u32 %v48_v0, 7  ;;  %v291_v6 = vcombine.low %v287_v1, %v287_v1  ;;  %v113_v8 = vld [vmem:[%s6139_s0 + $0x4] sm:$0xff]  ;;  %v4331_v10 = vld [vmem:[%s6140_s1 + $0x74] ss:$8 sps:$4 sm:$0xff]   ;;  %v4333_v12 = vld [vmem:[%s6140_s1 + $0x70] ss:$8 sps:$4 sm:$0xff]   ;;  %v635_v13 = vcombine.low %v631_v7, %v631_v7  ;;  %v463_v36 = vcombine.high %v459_v9, %v459_v9 }
   0x3   :  { %v47_v5 = vunpack.c.0.s8 %v46_v3  ;;  %1662 = vmatprep.subr.bf16.mxu0 %v4331_v10  ;;  %v4334_v14 = vld [vmem:[%s6140_s1 + $0x64] ss:$8 sps:$4 sm:$0xff]   ;;  %v4336_v18 = vld [vmem:[%s6140_s1 + $0x60] ss:$8 sps:$4 sm:$0xff]   ;;  %v4339_v19 = vld [vmem:[%s6140_s1 + $0x174] ss:$8 sps:$4 sm:$0xff]   ;;  %v117_v25 = vcombine.high %v113_v8, %v113_v8 }
   0x4   :  { %1663 = vmatpush1.bf16.msra.mxu0 %v4333_v12  ;;  %v4337_v23 = vld [vmem:[%s6140_s1 + $0x54] ss:$8 sps:$4 sm:$0xff]   ;;  %1705 = vmatprep.subr.bf16.mxu1 %v4339_v19  ;;  %v4342_v27 = vld [vmem:[%s6140_s1 + $0x170] ss:$8 sps:$4 sm:$0xff]   ;;  %v4345_v32 = vld [vmem:[%s6140_s1 + $0x164] ss:$8 sps:$4 sm:$0xff]  }
   0x5   :  { %v4922_v11 = vsub.s32 %v47_v5, %v4907_v4  ;;  %1664 = vmatprep.subr.bf16.mxu0 %v4334_v14  ;;  %v4341_v31 = vld [vmem:[%s6140_s1 + $0x50] ss:$8 sps:$4 sm:$0xff]   ;;  %v4343_v33 = vld [vmem:[%s6140_s1 + $0x44] ss:$8 sps:$4 sm:$0xff]   ;;  %1706 = vmatpush1.bf16.msra.mxu1 %v4342_v27  ;;  %v4347_v37 = vld [vmem:[%s6140_s1 + $0x40] ss:$8 sps:$4 sm:$0xff]  }
   0x6   :  { %v4348_v38 = vld [vmem:[%s6140_s1 + $0x160] ss:$8 sps:$4 sm:$0xff]   ;;  %1707 = vmatprep.subr.bf16.mxu1 %v4345_v32  ;;  %v4351_v42 = vld [vmem:[%s6140_s1 + $0x154] ss:$8 sps:$4 sm:$0xff]   ;;  %v4354_v47 = vld [vmem:[%s6140_s1 + $0x150] ss:$8 sps:$4 sm:$0xff]  }
   0x7   :  { %v298_v15 = vrot.slane %v291_v6, %v4922_v11  ;;  %v124_v16 = vrot.slane %v113_v8, %v4922_v11  ;;  %v470_v17 = vrot.slane %v459_v9, %v4922_v11  ;;  %v642_v26 = vrot.slane %v635_v13, %v4922_v11  ;;  %v4349_v43 = vld [vmem:[%s6140_s1 + $0x34] ss:$8 sps:$4 sm:$0xff]   ;;  %v4353_v51 = vld [vmem:[%s6140_s1 + $0x30] ss:$8 sps:$4 sm:$0xff]   ;;  %v4357_v52 = vld [vmem:[%s6140_s1 + $0x144] ss:$8 sps:$4 sm:$0xff]  }
   0x8   :  { %1665 = vmatpush1.bf16.msra.mxu0 %v4336_v18  ;;  %v4962_v34 = vrot.slane %v287_v1, %v4922_v11  ;;  %v4965_v35 = vrot.slane %v117_v25, %v4922_v11  ;;  %v4985_v45 = vrot.slane %v631_v7, %v4922_v11  ;;  %v4988_v46 = vrot.slane %v463_v36, %v4922_v11  ;;  %v4355_v53 = vld [vmem:[%s6140_s1 + $0x24] ss:$8 sps:$4 sm:$0xff]   ;;  %v4360_v55 = vld [vmem:[%s6140_s1 + $0x140] ss:$8 sps:$4 sm:$0xff]   ;;  %v4363_v60 = vld [vmem:[%s6140_s1 + $0x134] ss:$8 sps:$4 sm:$0xff]  }
   0x9   :  { %v321_v20 = vrot.slane %v298_v15, %v4922_v11  ;;  %v147_v21 = vrot.slane %v124_v16, %v4922_v11  ;;  %v132_v22 = vcombine.low %v124_v16, %v124_v16  ;;  %v306_v24 = vcombine.low %v298_v15, %v298_v15  ;;  %1666 = vmatprep.subr.bf16.mxu0 %v4337_v23  ;;  %v4359_v59 = vld [vmem:[%s6140_s1 + $0x20] ss:$8 sps:$4 sm:$0xff]   ;;  %v4361_v61 = vld [vmem:[%s6140_s1 + $0x14] ss:$8 sps:$4 sm:$0xff]   ;;  %v4366_v63 = vld [vmem:[%s6140_s1 + $0x130] ss:$8 sps:$4 sm:$0xff]  }
   0xa   :  { %v493_v28 = vrot.slane %v470_v17, %v4922_v11  ;;  %v478_v30 = vcombine.low %v470_v17, %v470_v17  ;;  %v650_v41 = vcombine.low %v642_v26, %v642_v26  ;;  %v665_v44 = vrot.slane %v642_v26, %v4922_v11  ;;  %1708 = vmatpush1.bf16.msra.mxu1 %v4348_v38  ;;  %v4329_v62 = vld [vmem:[%s6139_s0 + $0x15] ss:$0 sps:$4 sm:$0x33]   ;;  %v4365_v2 = vld [vmem:[%s6140_s1 + $0x10] ss:$8 sps:$4 sm:$0xff]  }
   0xb   :  { %354 = vrot.lane.b32.xlu1 %v321_v20, %s4838_s20  ;;  %179 = vrot.lane.b32.xlu0 %v147_v21, %s4838_s20  ;;  %v140_v29 = vrot.slane %v132_v22, %v4922_v11  ;;  %v314_v39 = vrot.slane %v306_v24, %v4922_v11  ;;  %v307_v49 = vcombine.low %v4962_v34, %v4962_v34  ;;  %v4369_v3 = vld [vmem:[%s6140_s1 + $0x124] ss:$8 sps:$4 sm:$0xff]   ;;  %v4372_v7 = vld [vmem:[%s6140_s1 + $0x120] ss:$8 sps:$4 sm:$0xff]  }
   0xc   :  { %v486_v40 = vrot.slane %v478_v30, %v4922_v11  ;;  %1667 = vmatpush1.bf16.msra.mxu0 %v4341_v31  ;;  %v658_v48 = vrot.slane %v650_v41, %v4922_v11  ;;  %v133_v50 = vcombine.low %v4965_v35, %v4965_v35  ;;  %1709 = vmatprep.subr.bf16.mxu1 %v4351_v42  ;;  %v3832_v5 = vld.sshfl [vmem:[%s6139_s0 + $0xc] sm:$0x5 pattern:$0x73625140]  ;;  %v4371_v13 = vld [vmem:[%s6140_s1] ss:$8 sps:$4 sm:$0xff]  }
   0xd   :  { %1668 = vmatprep.subr.bf16.mxu0 %v4343_v33  ;;  %v651_v54 = vcombine.low %v4985_v45, %v4985_v45  ;;  %v328_v56 = vrot.slane %v307_v49, %v4922_v11  ;;  %v479_v58 = vcombine.low %v4988_v46, %v4988_v46  ;;  %v4367_v6 = vld [vmem:[%s6140_s1 + $0x4] ss:$8 sps:$4 sm:$0xff]   ;;  %v335_v8 = vrot.slane %v4962_v34, %v4922_v11  ;;  %v4375_v14 = vld [vmem:[%s6140_s1 + $0x114] ss:$8 sps:$4 sm:$0xff]   ;;  %v4378_v19 = vld [vmem:[%s6140_s1 + $0x110] ss:$8 sps:$4 sm:$0xff]  }
   0xe   :  { %1710 = vmatpush1.bf16.msra.mxu1 %v4354_v47  ;;  %v154_v57 = vrot.slane %v133_v50, %v4922_v11  ;;  %v161_v9 = vrot.slane %v4965_v35, %v4922_v11  ;;  %v343_v10 = vrot.slane %v4329_v62, %v4922_v11  ;;  %v4330_v12 = vld [vmem:[%s6139_s0 + $0x27] ss:$0 sps:$4 sm:$0x33]   ;;  %v4373_v16 = vld [vmem:[%s6140_s1 + $0xf4] ss:$8 sps:$4 sm:$0xff]   ;;  %v679_v17 = vrot.slane %v4985_v45, %v4922_v11 }
   0xf   :  { %525 = vrot.lane.b32.xlu1 %v493_v28, %s4838_s20  ;;  %177 = vrot.lane.b32.xlu0 %v140_v29, %s4838_s20  ;;  %v672_v0 = vrot.slane %v651_v54, %v4922_v11  ;;  %v500_v1 = vrot.slane %v479_v58, %v4922_v11  ;;  %v3844_v15 = vld.sshfl [vmem:[%s6139_s0 + $0x1e] sm:$0x5 pattern:$0x73625140]  ;;  %v169_v18 = vcombine.low %v3832_v5, %v3832_v5  ;;  %v4377_v23 = vld [vmem:[%s6140_s1 + $0xf0] ss:$8 sps:$4 sm:$0xff]  }
  0x10   :  { %1669 = vmatpush1.bf16.msra.mxu0 %v4347_v37  ;;  %1711 = vmatprep.subr.bf16.mxu1 %v4357_v52  ;;  %v507_v20 = vrot.slane %v4988_v46, %v4922_v11  ;;  %v344_v21 = vcombine.low %v343_v10, %v343_v10  ;;  %v687_v22 = vrot.slane %v4330_v12, %v4922_v11  ;;  %v4381_v24 = vld [vmem:[%s6140_s1 + $0x104] ss:$8 sps:$4 sm:$0xff]   ;;  %v4384_v27 = vld [vmem:[%s6140_s1 + $0x100] ss:$8 sps:$4 sm:$0xff]   ;;  %v4387_v32 = vld [vmem:[%s6140_s1 + $0x1f4] ss:$8 sps:$4 sm:$0xff]  }
  0x11   :  { %1670 = vmatprep.subr.bf16.mxu0 %v4349_v43  ;;  %v4379_v25 = vld [vmem:[%s6140_s1 + $0xe4] ss:$8 sps:$4 sm:$0xff]   ;;  %v515_v26 = vcombine.low %v3844_v15, %v3844_v15  ;;  %v176_v29 = vrot.slane %v169_v18, %v4922_v11  ;;  %v4383_v31 = vld [vmem:[%s6140_s1 + $0xe0] ss:$8 sps:$4 sm:$0xff]   ;;  %v4385_v33 = vld [vmem:[%s6140_s1 + $0xd4] ss:$8 sps:$4 sm:$0xff]  }
  0x12   :  { %1712 = vmatpush1.bf16.msra.mxu1 %v4360_v55  ;;  %v351_v28 = vrot.slane %v344_v21, %v4922_v11  ;;  %v688_v30 = vcombine.low %v687_v22, %v687_v22  ;;  %v4390_v34 = vld [vmem:[%s6140_s1 + $0x1f0] ss:$8 sps:$4 sm:$0xff]   ;;  %v4393_v38 = vld [vmem:[%s6140_s1 + $0x1e4] ss:$8 sps:$4 sm:$0xff]   ;;  %v4396_v41 = vld [vmem:[%s6140_s1 + $0x1e0] ss:$8 sps:$4 sm:$0xff]  }
  0x13   :  { %352 = vrot.lane.b32.xlu1 %v314_v39, %s4838_s20  ;;  %523 = vrot.lane.b32.xlu0 %v486_v40, %s4838_s20  ;;  %v522_v36 = vrot.slane %v515_v26, %v4922_v11  ;;  %v4389_v37 = vld [vmem:[%s6140_s1 + $0xd0] ss:$8 sps:$4 sm:$0xff]   ;;  %v4391_v39 = vld [vmem:[%s6140_s1 + $0xc4] ss:$8 sps:$4 sm:$0xff]  }
  0x14   :  { %1671 = vmatpush1.bf16.msra.mxu0 %v4353_v51  ;;  %1713 = vmatprep.subr.bf16.mxu1 %v4363_v60  ;;  %v695_v35 = vrot.slane %v688_v30, %v4922_v11  ;;  %v4395_v40 = vld [vmem:[%s6140_s1 + $0xc0] ss:$8 sps:$4 sm:$0xff]   ;;  %v4399_v42 = vld [vmem:[%s6140_s1 + $0x1d4] ss:$8 sps:$4 sm:$0xff]   ;;  %v4402_v55 = vld [vmem:[%s6140_s1 + $0x1d0] ss:$8 sps:$4 sm:$0xff]  }
  0x15   :  { %1672 = vmatprep.subr.bf16.mxu0 %v4355_v53  ;;  %v40_v43 = vld [vmem:[%s6139_s0] sm:$0xff]  ;;  %v4397_v50 = vld [vmem:[%s6140_s1 + $0xb4] ss:$8 sps:$4 sm:$0xff]   ;;  %v4413_v12 = vld [vmem:[%s6140_s1 + $0x90] ss:$8 sps:$4 sm:$0xff]  }
  0x16   :  { %1714 = vmatpush1.bf16.msra.mxu1 %v4366_v63  ;;  %v44_v45 = vcombine.high %v40_v43, %v40_v43  ;;  %v51_v46 = vrot.slane %v40_v43, %v4922_v11  ;;  %v557_v49 = vld [vmem:[%s6139_s0 + $0x1b] sm:$0xff]  ;;  %v4405_v60 = vld [vmem:[%s6140_s1 + $0x1c4] ss:$8 sps:$4 sm:$0xff]   ;;  %v4564_v30 = vld [vmem:[%s6139_s0 + $0x23] ss:$0 sps:$4 sm:$0x11]  }
  0x17   :  { %698 = vrot.lane.b32.xlu1 %v665_v44, %s4838_s20  ;;  %696 = vrot.lane.b32.xlu0 %v658_v48, %s4838_s20  ;;  %v213_v44 = vld [vmem:[%s6139_s0 + $0x9] sm:$0xff]  ;;  %v386_v48 = vld [vmem:[%s6139_s0 + $0x12] sm:$0xff]  ;;  %v561_v53 = vcombine.low %v557_v49, %v557_v49 }
  0x18   :  { %1673 = vmatpush1.bf16.msra.mxu0 %v4359_v59  ;;  %1715 = vmatprep.subr.bf16.mxu1 %v4369_v3  ;;  %v217_v47 = vcombine.low %v213_v44, %v213_v44  ;;  %v390_v51 = vcombine.high %v386_v48, %v386_v48  ;;  %v397_v52 = vrot.slane %v386_v48, %v4922_v11  ;;  %v4408_v5 = vld [vmem:[%s6140_s1 + $0x1c0] ss:$8 sps:$4 sm:$0xff]   ;;  %v4417_v10 = vld [vmem:[%s6140_s1 + $0x1a4] ss:$8 sps:$4 sm:$0xff]   ;;  %v4428_v15 = vld [vmem:[%s6140_s1 + $0x194] ss:$8 sps:$4 sm:$0xff]  }
  0x19   :  { %1674 = vmatprep.subr.bf16.mxu0 %v4361_v61  ;;  %v5156_v54 = vrot.slane %v213_v44, %v4922_v11  ;;  %3827 = vst.sshfl [vmem:[#allocation2] sm:$0x5 pattern:$0x75316420] %v51_v46  ;;  %v58_v58 = vrot.slane %v44_v45, %v4922_v11  ;;  %v5164_v59 = vrot.slane %v557_v49, %v4922_v11  ;;  %v4433_v18 = vld [vmem:[%s6140_s1 + $0x190] ss:$8 sps:$4 sm:$0xff]  }
  0x1a   :  { %1716 = vmatpush1.bf16.msra.mxu1 %v4372_v7  ;;  %3839 = vst.sshfl [vmem:[#allocation2 + $0x24] sm:$0x5 pattern:$0x75316420] %v397_v52  ;;  %v568_v61 = vrot.slane %v561_v53, %v4922_v11  ;;  %v405_v62 = vcombine.high %v397_v52, %v397_v52  ;;  %v404_v63 = vrot.slane %v390_v51, %v4922_v11  ;;  %v4407_v7 = vld [vmem:[%s6140_s1 + $0xa0] ss:$8 sps:$4 sm:$0xff]  }
  0x1b   :  { %356 = vrot.lane.b32.xlu1 %v328_v56, %s4838_s20  ;;  %181 = vrot.lane.b32.xlu0 %v154_v57, %s4838_s20  ;;  %v224_v56 = vrot.slane %v217_v47, %v4922_v11  ;;  %v59_v57 = vcombine.high %v51_v46, %v51_v46  ;;  %3835 = vst.sshfl [vmem:[#allocation2 + $0x10] sm:$0xa pattern:$0x75316420] %v5156_v54 }
  0x1c   :  { %1675 = vmatpush1.bf16.msra.mxu0 %v4365_v2  ;;  %1717 = vmatprep.subr.bf16.mxu1 %v4375_v14  ;;  %3829 = vst.sshfl [vmem:[#allocation2 + $0x10] sm:$0x5 pattern:$0x75316420] %v58_v58  ;;  %v4403_v2 = vld [vmem:[%s6140_s1 + $0xa4] ss:$8 sps:$4 sm:$0xff]   ;;  %v576_v3 = vcombine.high %v568_v61, %v568_v61  ;;  %v60_v21 = vcombine.high %v58_v58, %v58_v58 }
  0x1d   :  { %1676 = vmatprep.subr.bf16.mxu0 %v4367_v6  ;;  %3833 = vst.sshfl [vmem:[#allocation2] sm:$0xa pattern:$0x75316420] %v224_v56  ;;  %v4411_v6 = vld [vmem:[%s6140_s1 + $0x1b4] ss:$8 sps:$4 sm:$0xff]   ;;  %v233_v22 = vcombine.high %v5156_v54, %v5156_v54 }
  0x1e   :  { %1718 = vmatpush1.bf16.msra.mxu1 %v4378_v19  ;;  %3828 = vst.sshfl [vmem:[#allocation2 + $0x8] sm:$0x5 pattern:$0x75316420] %v59_v57  ;;  %v4420_v14 = vld [vmem:[%s6140_s1 + $0x1a0] ss:$8 sps:$4 sm:$0xff]  }
  0x1f   :  { %700 = vrot.lane.b32.xlu1 %v672_v0, %s4838_s20  ;;  %527 = vrot.lane.b32.xlu0 %v500_v1, %s4838_s20  ;;  %v4401_v0 = vld [vmem:[%s6140_s1 + $0xb0] ss:$8 sps:$4 sm:$0xff]   ;;  %v232_v1 = vcombine.high %v224_v56, %v224_v56  ;;  %3847 = vst.sshfl [vmem:[#allocation2 + $0x34] sm:$0xa pattern:$0x75316420] %v5164_v59 }
  0x20   :  { %1677 = vmatpush1.bf16.msra.mxu0 %v4371_v13  ;;  %1719 = vmatprep.subr.bf16.mxu1 %v4381_v24  ;;  %3845 = vst.sshfl [vmem:[#allocation2 + $0x24] sm:$0xa pattern:$0x75316420] %v568_v61  ;;  %v4415_v13 = vld [vmem:[%s6140_s1 + $0x84] ss:$8 sps:$4 sm:$0xff]   ;;  %v577_v24 = vcombine.high %v5164_v59, %v5164_v59 }
  0x21   :  { %1678 = vmatprep.subr.bf16.mxu0 %v4373_v16  ;;  %3840 = vst.sshfl [vmem:[#allocation2 + $0x2c] sm:$0x5 pattern:$0x75316420] %v405_v62  ;;  %v4419_v16 = vld [vmem:[%s6140_s1 + $0x80] ss:$8 sps:$4 sm:$0xff]  }
  0x22   :  { %1720 = vmatpush1.bf16.msra.mxu1 %v4384_v27  ;;  %3841 = vst.sshfl [vmem:[#allocation2 + $0x34] sm:$0x5 pattern:$0x75316420] %v404_v63  ;;  %v4434_v19 = vld [vmem:[%s6140_s1 + $0x184] ss:$8 sps:$4 sm:$0xff]  }
  0x23   :  { %358 = vrot.lane.b32.xlu1 %v335_v8, %s4838_s20  ;;  %183 = vrot.lane.b32.xlu0 %v161_v9, %s4838_s20  ;;  %3834 = vst.sshfl [vmem:[#allocation2 + $0x8] sm:$0xa pattern:$0x75316420] %v232_v1  ;;  %v4409_v8 = vld [vmem:[%s6140_s1 + $0x94] ss:$8 sps:$4 sm:$0xff]  }
  0x24   :  { %1679 = vmatpush2.bf16.msra.mxu0 %v4377_v23  ;;  %1721 = vmatprep.subr.bf16.mxu1 %v4387_v32  ;;  %3846 = vst.sshfl [vmem:[#allocation2 + $0x2c] sm:$0xa pattern:$0x75316420] %v576_v3  ;;  %v4414_v9 = vld [vmem:[%s6140_s1 + $0x1b0] ss:$8 sps:$4 sm:$0xff]   ;;  %v406_v23 = vcombine.high %v404_v63, %v404_v63 }
  0x25   :  { %1680 = vmatprep.subr.bf16.mxu0 %v4379_v25  ;;  %v4442_v25 = vld [vmem:[%s6140_s1 + $0x374] ss:$8 sps:$4 sm:$0xff]   ;;  %3830 = vst.sshfl [vmem:[#allocation2 + $0x18] sm:$0x5 pattern:$0x75316420] %v60_v21 }
  0x26   :  { %1722 = vmatpush2.bf16.msra.mxu1 %v4390_v34  ;;  %3836 = vst.sshfl [vmem:[#allocation2 + $0x18] sm:$0xa pattern:$0x75316420] %v233_v22  ;;  %v4448_v21 = vld [vmem:[%s6140_s1 + $0x254] ss:$8 sps:$4 sm:$0xff]  }
  0x27   :  { %702 = vrot.lane.b32.xlu1 %v679_v17, %s4838_s20  ;;  %529 = vrot.lane.b32.xlu0 %v507_v20, %s4838_s20  ;;  %v4432_v17 = vld [vmem:[%s6140_s1 + $0x274] ss:$8 sps:$4 sm:$0xff]   ;;  %v4439_v20 = vld [vmem:[%s6140_s1 + $0x180] ss:$8 sps:$4 sm:$0xff]  }
  0x28   :  { %1681 = vmatpush2.bf16.msra.mxu0 %v4383_v31  ;;  %1723 = vmatprep.subr.bf16.mxu1 %v4393_v38  ;;  %3842 = vst.sshfl [vmem:[#allocation2 + $0x3c] sm:$0x5 pattern:$0x75316420] %v406_v23  ;;  %v613_v31 = vrot.slane %v4564_v30, %v4922_v11 }
  0x29   :  { %1682 = vmatprep.subr.bf16.mxu0 %v4385_v33  ;;  %3848 = vst.sshfl [vmem:[#allocation2 + $0x3c] sm:$0xa pattern:$0x75316420] %v577_v24 }
  0x2a   :  { %1724 = vmatpush2.bf16.msra.mxu1 %v4396_v41  ;;  %v3826_v26 = vld.sshfl [vmem:[%s6139_s0 + $0x8] sm:$0x1 pattern:$0x73625140] }
  0x2b   :  { %360 = vrot.lane.b32.xlu1 %v351_v28, %s4838_s20  ;;  %185 = vrot.lane.b32.xlu0 %v176_v29, %s4838_s20  ;;  %3831 = vst.sshfl [vmem:[#allocation2 + $0x20] sm:$0x1 pattern:$0x75316420] %v3826_v26 }
  0x2c   :  { %1683 = vmatpush2.bf16.msra.mxu0 %v4389_v37  ;;  %1725 = vmatprep.subr.bf16.mxu1 %v4399_v42  ;;  %v4563_v27 = vld [vmem:[%s6139_s0 + $0x11] ss:$0 sps:$4 sm:$0x11]  }
  0x2d   :  { %1684 = vmatprep.subr.bf16.mxu0 %v4391_v39  ;;  %v3838_v28 = vld.sshfl [vmem:[%s6139_s0 + $0x1a] sm:$0x1 pattern:$0x73625140]  ;;  %v269_v29 = vrot.slane %v4563_v27, %v4922_v11 }
  0x2e   :  { %1726 = vmatpush2.bf16.msra.mxu1 %v4402_v55  ;;  %3843 = vst.sshfl [vmem:[#allocation2 + $0x44] sm:$0x1 pattern:$0x75316420] %v3838_v28  ;;  %v4440_v28 = vld [vmem:[%s6140_s1 + $0x370] ss:$8 sps:$4 sm:$0xff]  }
  0x2f   :  { %704 = vrot.lane.b32.xlu1 %v695_v35, %s4838_s20  ;;  %531 = vrot.lane.b32.xlu0 %v522_v36, %s4838_s20  ;;  %3837 = vst.sshfl [vmem:[#allocation2 + $0x20] sm:$0x2 pattern:$0x75316420] %v269_v29  ;;  %v4446_v29 = vld [vmem:[%s6140_s1 + $0x250] ss:$8 sps:$4 sm:$0xff]  }
  0x30   :  { %1685 = vmatpush2.bf16.msra.mxu0 %v4395_v40  ;;  %1727 = vmatprep.subr.bf16.mxu1 %v4405_v60  ;;  %3849 = vst.sshfl [vmem:[#allocation2 + $0x44] sm:$0x2 pattern:$0x75316420] %v613_v31 }
  0x31   :  { %1686 = vmatprep.subr.bf16.mxu0 %v4397_v50 }
  0x32   :  { %1728 = vmatpush2.bf16.msra.mxu1 %v4408_v5  ;;  %v4430_v5 = vld [vmem:[%s6140_s1 + $0x270] ss:$8 sps:$4 sm:$0xff]  }
  0x33   :  { %1729 = vmatprep.subr.bf16.mxu1 %v4411_v6 }
  0x34   :  { %1687 = vmatpush2.bf16.msra.mxu0 %v4401_v0 }
  0x35   :  { %1688 = vmatprep.subr.bf16.mxu0 %v4403_v2 }
  0x36   :  { %1730 = vmatpush2.bf16.msra.mxu1 %v4414_v9 }
  0x37   :  { %1731 = vmatprep.subr.bf16.mxu1 %v4417_v10 }
  0x38   :  { %1689 = vmatpush2.bf16.msra.mxu0 %v4407_v7 }
  0x39   :  { %1690 = vmatprep.subr.bf16.mxu0 %v4409_v8  ;;  %v4438_v8 = vld [vmem:[%s6140_s1 + $0x264] ss:$8 sps:$4 sm:$0xff]  }
  0x3a   :  { %1732 = vmatpush2.bf16.msra.mxu1 %v4420_v14 }
  0x3b   :  { %1733 = vmatprep.subr.bf16.mxu1 %v4428_v15 }
  0x3c   :  { %1691 = vmatpush2.bf16.msra.mxu0 %v4413_v12 }
  0x3d   :  { %1692 = vmatprep.subr.bf16.mxu0 %v4415_v13 }
  0x3e   :  { %1734 = vmatpush2.bf16.msra.mxu1 %v4433_v18  ;;  %v4436_v18 = vld [vmem:[%s6140_s1 + $0x260] ss:$8 sps:$4 sm:$0xff]  }
  0x3f   :  { %1735 = vmatprep.subr.bf16.mxu1 %v4434_v19 }
  0x40   :  { %1693 = vmatpush2.bf16.msra.mxu0 %v4419_v16 }
  0x41   :  { %1748 = vmatprep.subr.bf16.mxu0 %v4432_v17 }
  0x42   :  { %1736 = vmatpush2.bf16.msra.mxu1 %v4439_v20 }
  0x43   :  { %1791 = vmatprep.subr.bf16.mxu1 %v4442_v25 }
  0x7d   :  { %v355_v32 = vpop.permute.xlu1 %354  ;;  %v180_v33 = vpop.permute.xlu0 %179 }
  0x7e   :  { %v188_v36 = vrot.slane %v180_v33, 4  ;;  %v363_v39 = vrot.slane %v355_v32, 4 }
  0x81   :  { %v526_v34 = vpop.permute.xlu1 %525  ;;  %v178_v35 = vpop.permute.xlu0 %177 }
  0x82   :  { %v187_v37 = vrot.slane %v178_v35, 4  ;;  %v534_v43 = vrot.slane %v526_v34, 4 }
  0x84   :  { %v193_v38 = vsel %vm192_vm0, %v187_v37, %v188_v36 }
  0x85   :  { %v195_v40 = vsel %vm194_vm1, %v178_v35, %v193_v38  ;;  %v353_v41 = vpop.permute.xlu1 %352  ;;  %v524_v42 = vpop.permute.xlu0 %523 }
  0x86   :  { %208 = vst [vmem:[#allocation2] sm:$0x22] %v195_v40  ;;  %v362_v44 = vrot.slane %v353_v41, 4  ;;  %v533_v45 = vrot.slane %v524_v42, 4 }
  0x88   :  { %v367_v46 = vsel %vm192_vm0, %v362_v44, %v363_v39  ;;  %v538_v47 = vsel %vm192_vm0, %v533_v45, %v534_v43  ;;  %v4457_v44 = vld [vmem:[%s6140_s1 + $0x234] ss:$8 sps:$4 sm:$0xff]  }
  0x89   :  { %v368_v48 = vsel %vm194_vm1, %v353_v41, %v367_v46  ;;  %v539_v49 = vsel %vm194_vm1, %v524_v42, %v538_v47  ;;  %v699_v50 = vpop.permute.xlu1 %698  ;;  %v697_v51 = vpop.permute.xlu0 %696  ;;  %v4449_v42 = vld [vmem:[%s6140_s1 + $0x240] ss:$8 sps:$4 sm:$0xff]   ;;  %v4460_v45 = vld [vmem:[%s6140_s1 + $0x354] ss:$8 sps:$4 sm:$0xff]  }
  0x8a   :  { %381 = vst [vmem:[#allocation2] sm:$0x88] %v368_v48  ;;  %552 = vst [vmem:[#allocation2 + $0x24] sm:$0x22] %v539_v49  ;;  %v707_v52 = vrot.slane %v699_v50, 4  ;;  %v706_v53 = vrot.slane %v697_v51, 4 }
  0x8c   :  { %v711_v54 = vsel %vm192_vm0, %v706_v53, %v707_v52 }
  0x8d   :  { %v712_v55 = vsel %vm194_vm1, %v697_v51, %v711_v54  ;;  %v357_v56 = vpop.permute.xlu1 %356  ;;  %v182_v57 = vpop.permute.xlu0 %181 }
  0x8e   :  { %725 = vst [vmem:[#allocation2 + $0x24] sm:$0x88] %v712_v55  ;;  %v364_v58 = vrot.slane %v357_v56, 4  ;;  %v189_v59 = vrot.slane %v182_v57, 4 }
  0x90   :  { %v369_v60 = vsel %vm192_vm0, %v363_v39, %v364_v58  ;;  %v196_v61 = vsel %vm192_vm0, %v188_v36, %v189_v59 }
  0x91   :  { %v370_v62 = vsel %vm194_vm1, %v355_v32, %v369_v60  ;;  %v197_v63 = vsel %vm194_vm1, %v180_v33, %v196_v61  ;;  %v701_v0 = vpop.permute.xlu1 %700  ;;  %v528_v1 = vpop.permute.xlu0 %527  ;;  %v4451_v32 = vld [vmem:[%s6140_s1 + $0x244] ss:$8 sps:$4 sm:$0xff]  }
  0x92   :  { %382 = vst [vmem:[#allocation2 + $0x8] sm:$0x88] %v370_v62  ;;  %209 = vst [vmem:[#allocation2 + $0x8] sm:$0x22] %v197_v63  ;;  %v708_v2 = vrot.slane %v701_v0, 4  ;;  %v535_v3 = vrot.slane %v528_v1, 4 }
  0x93   :  { %v4454_v33 = vld [vmem:[%s6140_s1 + $0x364] ss:$8 sps:$4 sm:$0xff]  }
  0x94   :  { %v713_v6 = vsel %vm192_vm0, %v707_v52, %v708_v2  ;;  %v540_v7 = vsel %vm192_vm0, %v534_v43, %v535_v3  ;;  %v4452_v43 = vld [vmem:[%s6140_s1 + $0x360] ss:$8 sps:$4 sm:$0xff]   ;;  %v4466_v63 = vld [vmem:[%s6140_s1 + $0x344] ss:$8 sps:$4 sm:$0xff]  }
  0x95   :  { %v714_v9 = vsel %vm194_vm1, %v699_v50, %v713_v6  ;;  %v541_v10 = vsel %vm194_vm1, %v526_v34, %v540_v7  ;;  %v4425_v12 = vld [vmem:[#allocation2] ss:$36 sps:$4 sm:$0xff]   ;;  %v359_v14 = vpop.permute.xlu1 %358  ;;  %v184_v15 = vpop.permute.xlu0 %183  ;;  %v4472_v6 = vld [vmem:[%s6140_s1 + $0x214] ss:$8 sps:$4 sm:$0xff]  }
  0x96   :  { %v4427_v13 = vld [vmem:[#allocation2 + $0x4] ss:$36 sps:$4 sm:$0xff]   ;;  %726 = vst [vmem:[#allocation2 + $0x2c] sm:$0x88] %v714_v9  ;;  %553 = vst [vmem:[#allocation2 + $0x2c] sm:$0x22] %v541_v10 }
  0x97   :  { %v365_v16 = vrot.slane %v359_v14, 4  ;;  %v190_v17 = vrot.slane %v184_v15, 4  ;;  %1694 = vmatprep.mubr.bf16.mxu0 %v4427_v13  ;;  %v4475_v7 = vld [vmem:[%s6140_s1 + $0x334] ss:$8 sps:$4 sm:$0xff]   ;;  %v4473_v9 = vld [vmem:[%s6140_s1 + $0x330] ss:$8 sps:$4 sm:$0xff]  }
  0x98   :  { %1695 = vmatmul.mubr.bf16.vlgmr.msra.gmra.mxu0 %v4425_v12  ;;  %v4478_v10 = vld [vmem:[%s6140_s1 + $0x204] ss:$8 sps:$4 sm:$0xff]  }
  0x99   :  { %v371_v19 = vsel %vm192_vm0, %v364_v58, %v365_v16  ;;  %v198_v20 = vsel %vm192_vm0, %v189_v59, %v190_v17  ;;  %1749 = vmatpush1.bf16.msra.mxu0 %v4430_v5  ;;  %v703_v24 = vpop.permute.xlu1 %702  ;;  %v530_v25 = vpop.permute.xlu0 %529  ;;  %v4463_v58 = vld [vmem:[%s6140_s1 + $0x224] ss:$8 sps:$4 sm:$0xff]   ;;  %v4464_v5 = vld [vmem:[%s6140_s1 + $0x340] ss:$8 sps:$4 sm:$0xff]  }
  0x9a   :  { %v372_v22 = vsel %vm194_vm1, %v357_v56, %v371_v19  ;;  %v199_v23 = vsel %vm194_vm1, %v182_v57, %v198_v20  ;;  %1750 = vmatprep.subr.bf16.mxu0 %v4438_v8  ;;  %v709_v26 = vrot.slane %v703_v24, 4  ;;  %v536_v27 = vrot.slane %v530_v25, 4  ;;  %v4455_v56 = vld [vmem:[%s6140_s1 + $0x230] ss:$8 sps:$4 sm:$0xff]   ;;  %v4481_v12 = vld [vmem:[%s6140_s1 + $0x324] ss:$8 sps:$4 sm:$0xff]  }
  0x9b   :  { %383 = vst [vmem:[#allocation2 + $0x10] sm:$0x88] %v372_v22  ;;  %210 = vst [vmem:[#allocation2 + $0x10] sm:$0x22] %v199_v23  ;;  %v4458_v57 = vld [vmem:[%s6140_s1 + $0x350] ss:$8 sps:$4 sm:$0xff]  }
  0x9c   :  { %v715_v30 = vsel %vm192_vm0, %v708_v2, %v709_v26  ;;  %v542_v31 = vsel %vm192_vm0, %v535_v3, %v536_v27  ;;  %v4461_v3 = vld [vmem:[%s6140_s1 + $0x220] ss:$8 sps:$4 sm:$0xff]   ;;  %v4470_v8 = vld [vmem:[%s6140_s1 + $0x210] ss:$8 sps:$4 sm:$0xff]   ;;  %v4490_v20 = vld [vmem:[%s6140_s1 + $0x2e4] ss:$8 sps:$4 sm:$0xff]  }
  0x9d   :  { %1751 = vmatpush1.bf16.msra.mxu0 %v4436_v18  ;;  %v716_v34 = vsel %vm194_vm1, %v701_v0, %v715_v30  ;;  %v543_v35 = vsel %vm194_vm1, %v528_v1, %v542_v31  ;;  %v4443_v36 = vld [vmem:[#allocation2 + $0x8] ss:$36 sps:$4 sm:$0xff]   ;;  %v361_v38 = vpop.permute.xlu1 %360  ;;  %v186_v39 = vpop.permute.xlu0 %185  ;;  %v4482_v18 = vld [vmem:[%s6140_s1 + $0x2f0] ss:$8 sps:$4 sm:$0xff]  }
  0x9e   :  { %v4445_v37 = vld [vmem:[#allocation2 + $0xc] ss:$36 sps:$4 sm:$0xff]   ;;  %727 = vst [vmem:[#allocation2 + $0x34] sm:$0x88] %v716_v34  ;;  %554 = vst [vmem:[#allocation2 + $0x34] sm:$0x22] %v543_v35  ;;  %1752 = vmatprep.subr.bf16.mxu0 %v4448_v21 }
  0x9f   :  { %v366_v40 = vrot.slane %v361_v38, 4  ;;  %v191_v41 = vrot.slane %v186_v39, 4  ;;  %1737 = vmatprep.mubr.bf16.mxu1 %v4445_v37  ;;  %v4485_v19 = vld [vmem:[%s6140_s1 + $0x310] ss:$8 sps:$4 sm:$0xff]   ;;  %v4493_v21 = vld [vmem:[%s6140_s1 + $0x304] ss:$8 sps:$4 sm:$0xff]  }
  0xa0   :  { %1738 = vmatmul.mubr.bf16.vlgmr.msra.gmra.mxu1 %v4443_v36  ;;  %v4488_v22 = vld [vmem:[%s6140_s1 + $0x2e0] ss:$8 sps:$4 sm:$0xff]  }
  0xa1   :  { %v373_v46 = vsel %vm192_vm0, %v365_v16, %v366_v40  ;;  %v375_v47 = vsel %vm194_vm1, %v361_v38, %v366_v40  ;;  %v200_v48 = vsel %vm192_vm0, %v190_v17, %v191_v41  ;;  %v202_v49 = vsel %vm194_vm1, %v186_v39, %v191_v41  ;;  %1753 = vmatpush1.bf16.msra.mxu0 %v4446_v29  ;;  %v705_v52 = vpop.permute.xlu1 %704  ;;  %v532_v53 = vpop.permute.xlu0 %531  ;;  %v4484_v16 = vld [vmem:[%s6140_s1 + $0x2f4] ss:$8 sps:$4 sm:$0xff]   ;;  %v4491_v23 = vld [vmem:[%s6140_s1 + $0x300] ss:$8 sps:$4 sm:$0xff]  }
  0xa2   :  { %1792 = vmatpush1.bf16.msra.mxu1 %v4440_v28  ;;  %v374_v50 = vsel %vm194_vm1, %v359_v14, %v373_v46  ;;  %385 = vst [vmem:[#allocation2 + $0x20] sm:$0x8] %v375_v47  ;;  %v201_v51 = vsel %vm194_vm1, %v184_v15, %v200_v48  ;;  %212 = vst [vmem:[#allocation2 + $0x20] sm:$0x2] %v202_v49  ;;  %1754 = vmatprep.subr.bf16.mxu0 %v4451_v32  ;;  %v710_v54 = vrot.slane %v705_v52, 4 }
  0xa3   :  { %1793 = vmatprep.subr.bf16.mxu1 %v4454_v33  ;;  %384 = vst [vmem:[#allocation2 + $0x18] sm:$0x88] %v374_v50  ;;  %211 = vst [vmem:[#allocation2 + $0x18] sm:$0x22] %v201_v51  ;;  %v537_v55 = vrot.slane %v532_v53, 4 }
  0xa4   :  { %v717_v59 = vsel %vm192_vm0, %v709_v26, %v710_v54  ;;  %v719_v60 = vsel %vm194_vm1, %v705_v52, %v710_v54  ;;  %v4476_v14 = vld [vmem:[%s6140_s1 + $0x200] ss:$8 sps:$4 sm:$0xff]   ;;  %v4487_v17 = vld [vmem:[%s6140_s1 + $0x314] ss:$8 sps:$4 sm:$0xff]   ;;  %v4494_v26 = vld [vmem:[%s6140_s1 + $0x2d0] ss:$8 sps:$4 sm:$0xff]  }
  0xa5   :  { %v544_v61 = vsel %vm192_vm0, %v536_v27, %v537_v55  ;;  %v546_v62 = vsel %vm194_vm1, %v532_v53, %v537_v55  ;;  %1755 = vmatpush1.bf16.msra.mxu0 %v4449_v42  ;;  %v4469_v0 = vld [vmem:[#allocation2 + $0x14] ss:$36 sps:$4 sm:$0xff]   ;;  %v718_v1 = vsel %vm194_vm1, %v703_v24, %v717_v59  ;;  %729 = vst [vmem:[#allocation2 + $0x44] sm:$0x8] %v719_v60  ;;  %v4479_v15 = vld [vmem:[%s6140_s1 + $0x320] ss:$8 sps:$4 sm:$0xff]  }
  0xa6   :  { %1794 = vmatpush1.bf16.msra.mxu1 %v4452_v43  ;;  %v545_v2 = vsel %vm194_vm1, %v530_v25, %v544_v61  ;;  %556 = vst [vmem:[#allocation2 + $0x44] sm:$0x2] %v546_v62  ;;  %1756 = vmatprep.subr.bf16.mxu0 %v4457_v44  ;;  %728 = vst [vmem:[#allocation2 + $0x3c] sm:$0x88] %v718_v1  ;;  %v4496_v24 = vld [vmem:[%s6140_s1 + $0x2d4] ss:$8 sps:$4 sm:$0xff]  }
  0xa7   :  { %1795 = vmatprep.subr.bf16.mxu1 %v4460_v45  ;;  %555 = vst [vmem:[#allocation2 + $0x3c] sm:$0x22] %v545_v2  ;;  %1780 = vmatprep.mubr.bf16.mxu0 %v4469_v0  ;;  %v4499_v25 = vld [vmem:[%s6140_s1 + $0x3f4] ss:$8 sps:$4 sm:$0xff]   ;;  %v4497_v27 = vld [vmem:[%s6140_s1 + $0x3f0] ss:$8 sps:$4 sm:$0xff]  }
  0xa9   :  { %1757 = vmatpush1.bf16.msra.mxu0 %v4455_v56 }
  0xaa   :  { %1796 = vmatpush1.bf16.msra.mxu1 %v4458_v57  ;;  %1758 = vmatprep.subr.bf16.mxu0 %v4463_v58 }
  0xab   :  { %1797 = vmatprep.subr.bf16.mxu1 %v4466_v63 }
  0xad   :  { %1759 = vmatpush1.bf16.msra.mxu0 %v4461_v3 }
  0xae   :  { %1798 = vmatpush1.bf16.msra.mxu1 %v4464_v5  ;;  %v4526_v13 = vld [vmem:[#allocation2 + $0x1c] ss:$36 sps:$4 sm:$0xff]   ;;  %1760 = vmatprep.subr.bf16.mxu0 %v4472_v6 }
  0xaf   :  { %1799 = vmatprep.subr.bf16.mxu1 %v4475_v7  ;;  %1823 = vmatprep.mubr.bf16.mxu1 %v4526_v13 }
  0xb1   :  { %1761 = vmatpush1.bf16.msra.mxu0 %v4470_v8 }
  0xb2   :  { %1800 = vmatpush1.bf16.msra.mxu1 %v4473_v9  ;;  %1762 = vmatprep.subr.bf16.mxu0 %v4478_v10 }
  0xb3   :  { %1801 = vmatprep.subr.bf16.mxu1 %v4481_v12 }
  0xb5   :  { %1763 = vmatpush1.bf16.msra.mxu0 %v4476_v14 }
  0xb6   :  { %1802 = vmatpush1.bf16.msra.mxu1 %v4479_v15  ;;  %1764 = vmatprep.subr.bf16.mxu0 %v4484_v16 }
  0xb7   :  { %1803 = vmatprep.subr.bf16.mxu1 %v4487_v17 }
  0xb9   :  { %1765 = vmatpush2.bf16.msra.mxu0 %v4482_v18 }
  0xba   :  { %1804 = vmatpush1.bf16.msra.mxu1 %v4485_v19  ;;  %1766 = vmatprep.subr.bf16.mxu0 %v4490_v20 }
  0xbb   :  { %1805 = vmatprep.subr.bf16.mxu1 %v4493_v21 }
  0xbd   :  { %1767 = vmatpush2.bf16.msra.mxu0 %v4488_v22 }
  0xbe   :  { %1806 = vmatpush1.bf16.msra.mxu1 %v4491_v23 }
  0xbf   :  { %16 = vsyncpa [#allocation9], 0  ;;  %1768 = vmatprep.subr.bf16.mxu0 %v4496_v24  ;;  %1807 = vmatprep.subr.bf16.mxu1 %v4499_v25  ;;  %v4502_v28 = vld [vmem:[%s6140_s1 + $0x2c4] ss:$8 sps:$4 sm:$0xff]   ;;  %v4500_v30 = vld [vmem:[%s6140_s1 + $0x2c0] ss:$8 sps:$4 sm:$0xff]  }
  0xc0   :  { %v4505_v29 = vld [vmem:[%s6140_s1 + $0x3e4] ss:$8 sps:$4 sm:$0xff]   ;;  %v4503_v31 = vld [vmem:[%s6140_s1 + $0x3e0] ss:$8 sps:$4 sm:$0xff]   ;;  %v4508_v32 = vld [vmem:[%s6140_s1 + $0x2b4] ss:$8 sps:$4 sm:$0xff]  }
  0xc1   :  { %1769 = vmatpush2.bf16.msra.mxu0 %v4494_v26  ;;  %v4511_v33 = vld [vmem:[%s6140_s1 + $0x3d4] ss:$8 sps:$4 sm:$0xff]   ;;  %v4506_v34 = vld [vmem:[%s6140_s1 + $0x2b0] ss:$8 sps:$4 sm:$0xff]   ;;  %v4514_v36 = vld [vmem:[%s6140_s1 + $0x2a4] ss:$8 sps:$4 sm:$0xff]  }
  0xc2   :  { %1808 = vmatpush2.bf16.msra.mxu1 %v4497_v27  ;;  %1770 = vmatprep.subr.bf16.mxu0 %v4502_v28  ;;  %v4509_v35 = vld [vmem:[%s6140_s1 + $0x3d0] ss:$8 sps:$4 sm:$0xff]   ;;  %v4517_v37 = vld [vmem:[%s6140_s1 + $0x3c4] ss:$8 sps:$4 sm:$0xff]   ;;  %v4512_v38 = vld [vmem:[%s6140_s1 + $0x2a0] ss:$8 sps:$4 sm:$0xff]  }
  0xc3   :  { %1809 = vmatprep.subr.bf16.mxu1 %v4505_v29  ;;  %v4515_v39 = vld [vmem:[%s6140_s1 + $0x3c0] ss:$8 sps:$4 sm:$0xff]   ;;  %v4520_v40 = vld [vmem:[%s6140_s1 + $0x294] ss:$8 sps:$4 sm:$0xff]   ;;  %v4518_v42 = vld [vmem:[%s6140_s1 + $0x290] ss:$8 sps:$4 sm:$0xff]  }
  0xc4   :  { %v4523_v41 = vld [vmem:[%s6140_s1 + $0x3b4] ss:$8 sps:$4 sm:$0xff]   ;;  %v4521_v43 = vld [vmem:[%s6140_s1 + $0x3b0] ss:$8 sps:$4 sm:$0xff]   ;;  %v4529_v44 = vld [vmem:[%s6140_s1 + $0x284] ss:$8 sps:$4 sm:$0xff]  }
  0xc5   :  { %1771 = vmatpush2.bf16.msra.mxu0 %v4500_v30  ;;  %v4532_v45 = vld [vmem:[%s6140_s1 + $0x3a4] ss:$8 sps:$4 sm:$0xff]   ;;  %v4527_v46 = vld [vmem:[%s6140_s1 + $0x280] ss:$8 sps:$4 sm:$0xff]   ;;  %v4535_v48 = vld [vmem:[%s6140_s1 + $0x394] ss:$8 sps:$4 sm:$0xff]  }
  0xc6   :  { %1810 = vmatpush2.bf16.msra.mxu1 %v4503_v31  ;;  %1772 = vmatprep.subr.bf16.mxu0 %v4508_v32  ;;  %v4530_v47 = vld [vmem:[%s6140_s1 + $0x3a0] ss:$8 sps:$4 sm:$0xff]   ;;  %v4538_v49 = vld [vmem:[%s6140_s1 + $0x474] ss:$8 sps:$4 sm:$0xff]   ;;  %v4533_v50 = vld [vmem:[%s6140_s1 + $0x390] ss:$8 sps:$4 sm:$0xff]  }
  0xc7   :  { %1811 = vmatprep.subr.bf16.mxu1 %v4511_v33  ;;  %v4536_v51 = vld [vmem:[%s6140_s1 + $0x470] ss:$8 sps:$4 sm:$0xff]   ;;  %v4541_v53 = vld [vmem:[%s6140_s1 + $0x384] ss:$8 sps:$4 sm:$0xff]   ;;  %v4539_v55 = vld [vmem:[%s6140_s1 + $0x380] ss:$8 sps:$4 sm:$0xff]  }
  0xc8   :  { %v4467_v52 = vld [vmem:[#allocation2 + $0x10] ss:$36 sps:$4 sm:$0xff]   ;;  %v4544_v54 = vld [vmem:[%s6140_s1 + $0x464] ss:$8 sps:$4 sm:$0xff]   ;;  %v4542_v56 = vld [vmem:[%s6140_s1 + $0x460] ss:$8 sps:$4 sm:$0xff]  }
  0xc9   :  { %1773 = vmatpush2.bf16.msra.mxu0 %v4506_v34  ;;  %v4547_v57 = vld [vmem:[%s6140_s1 + $0x454] ss:$8 sps:$4 sm:$0xff]   ;;  %v4839_v58 = vmov 0   ;;  %v4545_v59 = vld [vmem:[%s6140_s1 + $0x450] ss:$8 sps:$4 sm:$0xff]   ;;  %vm3114_vm2 = vcmask 1040384  }
  0xca   :  { %1812 = vmatpush2.bf16.msra.mxu1 %v4509_v35  ;;  %1774 = vmatprep.subr.bf16.mxu0 %v4514_v36  ;;  %v4524_v60 = vld [vmem:[#allocation2 + $0x18] ss:$36 sps:$4 sm:$0xff]   ;;  %v4550_v61 = vld [vmem:[%s6140_s1 + $0x444] ss:$8 sps:$4 sm:$0xff]   ;;  %v4548_v62 = vld [vmem:[%s6140_s1 + $0x440] ss:$8 sps:$4 sm:$0xff]  }
  0xcb   :  { %1813 = vmatprep.subr.bf16.mxu1 %v4517_v37  ;;  %v4553_v63 = vld [vmem:[%s6140_s1 + $0x434] ss:$8 sps:$4 sm:$0xff]   ;;  %v4551_v0 = vld [vmem:[%s6140_s1 + $0x430] ss:$8 sps:$4 sm:$0xff]   ;;  %v4556_v1 = vld [vmem:[%s6140_s1 + $0x424] ss:$8 sps:$4 sm:$0xff]  }
  0xcc   :  { %v4554_v2 = vld [vmem:[%s6140_s1 + $0x420] ss:$8 sps:$4 sm:$0xff]   ;;  %v4559_v3 = vld [vmem:[%s6140_s1 + $0x414] ss:$8 sps:$4 sm:$0xff]   ;;  %v4557_v5 = vld [vmem:[%s6140_s1 + $0x410] ss:$8 sps:$4 sm:$0xff]  }
  0xcd   :  { %1775 = vmatpush2.bf16.msra.mxu0 %v4512_v38  ;;  %v4562_v6 = vld [vmem:[%s6140_s1 + $0x404] ss:$8 sps:$4 sm:$0xff]   ;;  %v4560_v7 = vld [vmem:[%s6140_s1 + $0x400] ss:$8 sps:$4 sm:$0xff]   ;;  %v4568_v9 = vld [vmem:[%s6142_s3 + $0x74] ss:$8 sps:$4 sm:$0xff]  }
  0xce   :  { %1814 = vmatpush2.bf16.msra.mxu1 %v4515_v39  ;;  %1776 = vmatprep.subr.bf16.mxu0 %v4520_v40  ;;  %v4565_v8 = vld [vmem:[#allocation2 + $0x20] ss:$36 sps:$4 sm:$0xff]   ;;  %v4566_v10 = vld [vmem:[%s6142_s3 + $0x70] ss:$8 sps:$4 sm:$0xff]   ;;  %v4571_v12 = vld [vmem:[%s6142_s3 + $0x174] ss:$8 sps:$4 sm:$0xff]  }
  0xcf   :  { %1815 = vmatprep.subr.bf16.mxu1 %v4523_v41  ;;  %v4569_v13 = vld [vmem:[%s6142_s3 + $0x170] ss:$8 sps:$4 sm:$0xff]   ;;  %v4574_v14 = vld [vmem:[%s6142_s3 + $0x64] ss:$8 sps:$4 sm:$0xff]   ;;  %v4572_v15 = vld [vmem:[%s6142_s3 + $0x60] ss:$8 sps:$4 sm:$0xff]  }
  0xd0   :  { %v4575_v16 = vld [vmem:[%s6142_s3 + $0x160] ss:$8 sps:$4 sm:$0xff]   ;;  %v4577_v17 = vld [vmem:[%s6142_s3 + $0x164] ss:$8 sps:$4 sm:$0xff]   ;;  %v4578_v18 = vld [vmem:[%s6142_s3 + $0x50] ss:$8 sps:$4 sm:$0xff]  }
  0xd1   :  { %1777 = vmatpush2.bf16.msra.mxu0 %v4518_v42  ;;  %v4580_v19 = vld [vmem:[%s6142_s3 + $0x54] ss:$8 sps:$4 sm:$0xff]   ;;  %v4586_v21 = vld [vmem:[%s6142_s3 + $0x44] ss:$8 sps:$4 sm:$0xff]   ;;  %v4581_v22 = vld [vmem:[%s6142_s3 + $0x150] ss:$8 sps:$4 sm:$0xff]  }
  0xd2   :  { %1816 = vmatpush2.bf16.msra.mxu1 %v4521_v43  ;;  %1778 = vmatprep.subr.bf16.mxu0 %v4529_v44  ;;  %v4583_v20 = vld [vmem:[%s6142_s3 + $0x154] ss:$8 sps:$4 sm:$0xff]   ;;  %v4589_v23 = vld [vmem:[%s6142_s3 + $0x144] ss:$8 sps:$4 sm:$0xff]   ;;  %v4584_v24 = vld [vmem:[%s6142_s3 + $0x40] ss:$8 sps:$4 sm:$0xff]  }
  0xd3   :  { %1817 = vmatprep.subr.bf16.mxu1 %v4532_v45  ;;  %v4592_v25 = vld [vmem:[%s6142_s3 + $0x34] ss:$8 sps:$4 sm:$0xff]   ;;  %v4587_v26 = vld [vmem:[%s6142_s3 + $0x140] ss:$8 sps:$4 sm:$0xff]   ;;  %v4590_v28 = vld [vmem:[%s6142_s3 + $0x30] ss:$8 sps:$4 sm:$0xff]  }
  0xd4   :  { %v4595_v27 = vld [vmem:[%s6142_s3 + $0x134] ss:$8 sps:$4 sm:$0xff]   ;;  %v4598_v29 = vld [vmem:[%s6142_s3 + $0x24] ss:$8 sps:$4 sm:$0xff]   ;;  %v4593_v30 = vld [vmem:[%s6142_s3 + $0x130] ss:$8 sps:$4 sm:$0xff]  }
  0xd5   :  { %1779 = vmatpush2.bf16.msra.mxu0 %v4527_v46  ;;  %v4596_v31 = vld [vmem:[%s6142_s3 + $0x20] ss:$8 sps:$4 sm:$0xff]   ;;  %v4601_v32 = vld [vmem:[%s6142_s3 + $0x124] ss:$8 sps:$4 sm:$0xff]   ;;  %v4604_v34 = vld [vmem:[%s6142_s3 + $0x14] ss:$8 sps:$4 sm:$0xff]  }
  0xd6   :  { %1818 = vmatpush2.bf16.msra.mxu1 %v4530_v47  ;;  %1834 = vmatprep.subr.bf16.mxu0 %v4538_v49  ;;  %v4599_v33 = vld [vmem:[%s6142_s3 + $0x120] ss:$8 sps:$4 sm:$0xff]   ;;  %v4602_v35 = vld [vmem:[%s6142_s3 + $0x10] ss:$8 sps:$4 sm:$0xff]   ;;  %v4607_v36 = vld [vmem:[%s6142_s3 + $0x114] ss:$8 sps:$4 sm:$0xff]  }
  0xd7   :  { %1819 = vmatprep.subr.bf16.mxu1 %v4535_v48  ;;  %v4605_v37 = vld [vmem:[%s6142_s3 + $0x110] ss:$8 sps:$4 sm:$0xff]   ;;  %v4610_v38 = vld [vmem:[%s6142_s3 + $0x4] ss:$8 sps:$4 sm:$0xff]   ;;  %v4608_v39 = vld [vmem:[%s6142_s3] ss:$8 sps:$4 sm:$0xff]  }
  0xd8   :  { %1781 = vmatmul.mubr.bf16.vlgmr.msra.gmra.mxu0 %v4467_v52  ;;  %v4613_v40 = vld [vmem:[%s6142_s3 + $0x104] ss:$8 sps:$4 sm:$0xff]   ;;  %v4611_v41 = vld [vmem:[%s6142_s3 + $0x100] ss:$8 sps:$4 sm:$0xff]   ;;  %v4616_v42 = vld [vmem:[%s6142_s3 + $0xf4] ss:$8 sps:$4 sm:$0xff]  }
  0xd9   :  { %1835 = vmatpush1.bf16.msra.mxu0 %v4536_v51  ;;  %1866 = vmatprep.mubr.bf16.mxu0 %v4839_v58  ;;  %v4614_v43 = vld [vmem:[%s6142_s3 + $0xf0] ss:$8 sps:$4 sm:$0xff]   ;;  %v4619_v44 = vld [vmem:[%s6142_s3 + $0x1f4] ss:$8 sps:$4 sm:$0xff]   ;;  %v4622_v46 = vld [vmem:[%s6142_s3 + $0xe4] ss:$8 sps:$4 sm:$0xff]  }
  0xda   :  { %1820 = vmatpush2.bf16.msra.mxu1 %v4533_v50  ;;  %1836 = vmatprep.subr.bf16.mxu0 %v4544_v54  ;;  %v4617_v45 = vld [vmem:[%s6142_s3 + $0x1f0] ss:$8 sps:$4 sm:$0xff]   ;;  %v4620_v47 = vld [vmem:[%s6142_s3 + $0xe0] ss:$8 sps:$4 sm:$0xff]   ;;  %v4625_v48 = vld [vmem:[%s6142_s3 + $0x1e4] ss:$8 sps:$4 sm:$0xff]  }
  0xdb   :  { %1821 = vmatprep.subr.bf16.mxu1 %v4541_v53  ;;  %v4623_v49 = vld [vmem:[%s6142_s3 + $0x1e0] ss:$8 sps:$4 sm:$0xff]   ;;  %v4628_v50 = vld [vmem:[%s6142_s3 + $0xd4] ss:$8 sps:$4 sm:$0xff]   ;;  %v4626_v51 = vld [vmem:[%s6142_s3 + $0xd0] ss:$8 sps:$4 sm:$0xff]  }
  0xdc   :  { %v4631_v52 = vld [vmem:[%s6142_s3 + $0x1d4] ss:$8 sps:$4 sm:$0xff]   ;;  %v4629_v53 = vld [vmem:[%s6142_s3 + $0x1d0] ss:$8 sps:$4 sm:$0xff]   ;;  %v4634_v54 = vld [vmem:[%s6142_s3 + $0xc4] ss:$8 sps:$4 sm:$0xff]  }
  0xdd   :  { %1837 = vmatpush1.bf16.msra.mxu0 %v4542_v56  ;;  %v4637_v56 = vld [vmem:[%s6142_s3 + $0x1c4] ss:$8 sps:$4 sm:$0xff]   ;;  %v4640_v58 = vld [vmem:[%s6142_s3 + $0xb4] ss:$8 sps:$4 sm:$0xff]   ;;  %vm3115_vm3 = vcmask 517121   ;;  %vm3131_vm5 = vcmask 1040896  }
  0xde   :  { %1822 = vmatpush2.bf16.msra.mxu1 %v4539_v55  ;;  %1838 = vmatprep.subr.bf16.mxu0 %v4547_v57  ;;  %v4632_v55 = vld [vmem:[%s6142_s3 + $0xc0] ss:$8 sps:$4 sm:$0xff]   ;;  %vm5995_vm4 = vmor %vm3115_vm3, %vm3114_vm2  ;;  %vm3132_vm6 = vcmask 1041409   ;;  %vm3140_vm8 = vcmask 1042434   ;;  %vm3142_vm11 = vcmask 1043459   ;;  %vm3144_vm13 = vcmask 520196  }
  0xdf   :  { %2928 = vmatprep.subr.bf16.mxu1 %v4568_v9  ;;  %v4635_v57 = vld [vmem:[%s6142_s3 + $0x1c0] ss:$8 sps:$4 sm:$0xff]   ;;  %vm3139_vm7 = vmor %vm3132_vm6, %vm3114_vm2  ;;  %vm4842_vm15 = vmmov 0   ;;  %vm3613_vm0 = vcmask 516096   ;;  %s4843_s0 = smov [#allocation8]  }
  0xe0   :  { %v4656_v9 = vld [vmem:[%s6142_s3 + $0x80] ss:$8 sps:$4 sm:$0xff]   ;;  %vm3133_vm9 = vmor %vm3132_vm6, %vm3131_vm5  ;;  %s3818_s18 = sshll.u32 %s4843_s0, 4  ;;  %s3819_s18 = int_to_ptr.vmem [resolvable:$true] %s3818_s18 }
  0xe1   :  { %1824 = vmatmul.mubr.bf16.vlgmr.msra.gmra.mxu1 %v4524_v60  ;;  %1839 = vmatpush1.bf16.msra.mxu0 %v4545_v59  ;;  %v4638_v59 = vld [vmem:[%s6142_s3 + $0xb0] ss:$8 sps:$4 sm:$0xff]   ;;  %v4643_v60 = vld [vmem:[%s6142_s3 + $0x1b4] ss:$8 sps:$4 sm:$0xff]   ;;  %vm3141_vm10 = vmor %vm3140_vm8, %vm3139_vm7  ;;  %p4820_p1 = scmp.lt.s32.totalorder %s3819_s18, %s3819_s18 }
  0xe2   :  { %1840 = vmatprep.subr.bf16.mxu0 %v4550_v61  ;;  %2929 = vmatpush1.bf16.msra.mxu1 %v4566_v10  ;;  %v4641_v61 = vld [vmem:[%s6142_s3 + $0x1b0] ss:$8 sps:$4 sm:$0xff]   ;;  %v4659_v10 = vld [vmem:[%s6142_s3 + $0x180] ss:$8 sps:$4 sm:$0xff]   ;;  %vm3143_vm12 = vmor %vm3142_vm11, %vm3141_vm10 }
  0xe3   :  { %2930 = vmatprep.subr.bf16.mxu1 %v4574_v14  ;;  %vm3145_vm14 = vmor %vm3144_vm13, %vm3143_vm12 }
  0xe5   :  { %1841 = vmatpush1.bf16.msra.mxu0 %v4548_v62  ;;  %v4644_v62 = vld [vmem:[%s6142_s3 + $0xa0] ss:$8 sps:$4 sm:$0xff]  }
  0xe6   :  { %1842 = vmatprep.subr.bf16.mxu0 %v4553_v63  ;;  %2931 = vmatpush1.bf16.msra.mxu1 %v4572_v15  ;;  %v4646_v63 = vld [vmem:[%s6142_s3 + $0xa4] ss:$8 sps:$4 sm:$0xff]  }
  0xe7   :  { %2932 = vmatprep.subr.bf16.mxu1 %v4580_v19 }
  0xe9   :  { %1843 = vmatpush1.bf16.msra.mxu0 %v4551_v0  ;;  %v4649_v0 = vld [vmem:[%s6142_s3 + $0x1a4] ss:$8 sps:$4 sm:$0xff]  }
  0xea   :  { %1844 = vmatprep.subr.bf16.mxu0 %v4556_v1  ;;  %2933 = vmatpush1.bf16.msra.mxu1 %v4578_v18  ;;  %v4647_v1 = vld [vmem:[%s6142_s3 + $0x1a0] ss:$8 sps:$4 sm:$0xff]  }
  0xeb   :  { %2934 = vmatprep.subr.bf16.mxu1 %v4586_v21  ;;  %v888_v21 = vsub.s32 0, %v4907_v4 }
  0xed   :  { %1845 = vmatpush1.bf16.msra.mxu0 %v4554_v2  ;;  %v4652_v2 = vld [vmem:[%s6142_s3 + $0x94] ss:$8 sps:$4 sm:$0xff]  }
  0xee   :  { %1846 = vmatprep.subr.bf16.mxu0 %v4559_v3  ;;  %2935 = vmatpush1.bf16.msra.mxu1 %v4584_v24  ;;  %v4655_v3 = vld [vmem:[%s6142_s3 + $0x194] ss:$8 sps:$4 sm:$0xff]   ;;  %v892_v24 = vsub.s32 1, %v4907_v4 }
  0xef   :  { %2936 = vmatprep.subr.bf16.mxu1 %v4592_v25 }
  0xf1   :  { %1847 = vmatpush1.bf16.msra.mxu0 %v4557_v5  ;;  %v4650_v5 = vld [vmem:[%s6142_s3 + $0x90] ss:$8 sps:$4 sm:$0xff]  }
  0xf2   :  { %1848 = vmatprep.subr.bf16.mxu0 %v4562_v6  ;;  %2937 = vmatpush1.bf16.msra.mxu1 %v4590_v28  ;;  %v4658_v6 = vld [vmem:[%s6142_s3 + $0x84] ss:$8 sps:$4 sm:$0xff]  }
  0xf3   :  { %2938 = vmatprep.subr.bf16.mxu1 %v4598_v29 }
  0xf5   :  { %1849 = vmatpush1.bf16.msra.mxu0 %v4560_v7  ;;  %v4653_v7 = vld [vmem:[%s6142_s3 + $0x190] ss:$8 sps:$4 sm:$0xff]  }
  0xf6   :  { %2969 = vmatprep.subr.bf16.mxu0 %v4571_v12  ;;  %2939 = vmatpush1.bf16.msra.mxu1 %v4596_v31  ;;  %v4666_v12 = vld [vmem:[%s6142_s3 + $0x274] ss:$8 sps:$4 sm:$0xff]  }
  0xf7   :  { %2940 = vmatprep.subr.bf16.mxu1 %v4604_v34 }
  0xf8   :  { %1867 = vmatmul.mubr.bf16.vlgmr.msra.gmra.mxu0 %v4565_v8  ;;  %v4661_v8 = vld [vmem:[%s6142_s3 + $0x184] ss:$8 sps:$4 sm:$0xff]  }
  0xf9   :  { %2970 = vmatpush1.bf16.msra.mxu0 %v4569_v13  ;;  %v4673_v13 = vld [vmem:[%s6142_s3 + $0x374] ss:$8 sps:$4 sm:$0xff]  }
  0xfa   :  { %2971 = vmatprep.subr.bf16.mxu0 %v4577_v17  ;;  %2941 = vmatpush1.bf16.msra.mxu1 %v4602_v35  ;;  %v4840_v35 = vmov 1966171168  }
  0xfb   :  { %2942 = vmatprep.subr.bf16.mxu1 %v4610_v38 }
  0xfd   :  { %2972 = vmatpush1.bf16.msra.mxu0 %v4575_v16 }
  0xfe   :  { %2973 = vmatprep.subr.bf16.mxu0 %v4583_v20  ;;  %2943 = vmatpush1.bf16.msra.mxu1 %v4608_v39 }
  0xff   :  { %2944 = vmatprep.subr.bf16.mxu1 %v4616_v42 }
 0x101   :  { %2974 = vmatpush1.bf16.msra.mxu0 %v4581_v22  ;;  %v884_v22 = vld [vmem:[%s6141_s2] sm:$0x3] }
 0x102   :  { %2975 = vmatprep.subr.bf16.mxu0 %v4589_v23  ;;  %2945 = vmatpush2.bf16.msra.mxu1 %v4614_v43  ;;  %v893_v29 = vrot.slane %v884_v22, %v892_v24 }
 0x103   :  { %2946 = vmatprep.subr.bf16.mxu1 %v4622_v46 }
 0x105   :  { %2976 = vmatpush1.bf16.msra.mxu0 %v4587_v26  ;;  %v889_v26 = vrot.slane %v884_v22, %v888_v21 }
 0x106   :  { %2977 = vmatprep.subr.bf16.mxu0 %v4595_v27  ;;  %2947 = vmatpush2.bf16.msra.mxu1 %v4620_v47 }
 0x107   :  { %2948 = vmatprep.subr.bf16.mxu1 %v4628_v50 }
 0x109   :  { %2978 = vmatpush1.bf16.msra.mxu0 %v4593_v30 }
 0x10a   :  { %2979 = vmatprep.subr.bf16.mxu0 %v4601_v32  ;;  %2949 = vmatpush2.bf16.msra.mxu1 %v4626_v51 }
 0x10b   :  { %2950 = vmatprep.subr.bf16.mxu1 %v4634_v54 }
 0x10d   :  { %2980 = vmatpush1.bf16.msra.mxu0 %v4599_v33 }
 0x10e   :  { %2981 = vmatprep.subr.bf16.mxu0 %v4607_v36  ;;  %2951 = vmatpush2.bf16.msra.mxu1 %v4632_v55  ;;  %v1887_v36 = vunpack.c.l.s4 %v4840_v35 }
 0x10f   :  { %2952 = vmatprep.subr.bf16.mxu1 %v4640_v58 }
 0x110   :  { %v1888_v47 = vunpack.c.0.s8 %v1887_v36 }
 0x111   :  { %2982 = vmatpush1.bf16.msra.mxu0 %v4605_v37 }
 0x112   :  { %2983 = vmatprep.subr.bf16.mxu0 %v4613_v40  ;;  %2953 = vmatpush2.bf16.msra.mxu1 %v4638_v59 }
 0x113   :  { %2954 = vmatprep.subr.bf16.mxu1 %v4646_v63 }
 0x115   :  { %2984 = vmatpush1.bf16.msra.mxu0 %v4611_v41 }
 0x116   :  { %2985 = vmatprep.subr.bf16.mxu0 %v4619_v44  ;;  %2955 = vmatpush2.bf16.msra.mxu1 %v4644_v62 }
 0x117   :  { %2956 = vmatprep.subr.bf16.mxu1 %v4652_v2 }
 0x119   :  { %2986 = vmatpush2.bf16.msra.mxu0 %v4617_v45 }
 0x11a   :  { %2987 = vmatprep.subr.bf16.mxu0 %v4625_v48  ;;  %2957 = vmatpush2.bf16.msra.mxu1 %v4650_v5 }
 0x11b   :  { %2958 = vmatprep.subr.bf16.mxu1 %v4658_v6 }
 0x11d   :  { %2988 = vmatpush2.bf16.msra.mxu0 %v4623_v49 }
 0x11e   :  { %2989 = vmatprep.subr.bf16.mxu0 %v4631_v52  ;;  %2959 = vmatpush2.bf16.msra.mxu1 %v4656_v9 }
 0x11f   :  { %3010 = vmatprep.subr.bf16.mxu1 %v4666_v12 }
 0x121   :  { %2990 = vmatpush2.bf16.msra.mxu0 %v4629_v53 }
 0x122   :  { %2991 = vmatprep.subr.bf16.mxu0 %v4637_v56 }
 0x125   :  { %2992 = vmatpush2.bf16.msra.mxu0 %v4635_v57  ;;  %v5723_v57 = vsub.s32 %v1888_v47, %v4907_v4  ;;  %v4676_v47 = vld [vmem:[%s6142_s3 + $0x264] ss:$8 sps:$4 sm:$0xff]   ;;  %v4774_v4 = vld [vmem:[%s6144_s5 + $0xb0] sm:$0xff]  }
 0x126   :  { %2993 = vmatprep.subr.bf16.mxu0 %v4643_v60 }
 0x129   :  { %2994 = vmatpush2.bf16.msra.mxu0 %v4641_v61 }
 0x12a   :  { %2995 = vmatprep.subr.bf16.mxu0 %v4649_v0 }
 0x12d   :  { %2996 = vmatpush2.bf16.msra.mxu0 %v4647_v1 }
 0x12e   :  { %2997 = vmatprep.subr.bf16.mxu0 %v4655_v3 }
 0x131   :  { %2998 = vmatpush2.bf16.msra.mxu0 %v4653_v7 }
 0x132   :  { %2999 = vmatprep.subr.bf16.mxu0 %v4661_v8 }
 0x135   :  { %3000 = vmatpush2.bf16.msra.mxu0 %v4659_v10 }
 0x136   :  { %3051 = vmatprep.subr.bf16.mxu0 %v4673_v13 }
 0x158   :  { %v1696_v14 = vpop.f32.mrf.mxu0 }
 0x159   :  { %v1697_v30 = vadd.f32 %v1696_v14, %v889_v26 }
 0x15a   :  { %v1698_v15 = vpop.f32.mrf.mxu0 }
 0x15b   :  { %v1699_v33 = vadd.f32 %v1698_v15, %v893_v29 }
 0x15c   :  { %v1700_v17 = vpop.f32.mrf.mxu0 }
 0x15d   :  { %v1701_v37 = vadd.f32 %v1700_v17, %v889_v26 }
 0x15e   :  { %v1702_v19 = vpop.f32.mrf.mxu0 }
 0x15f   :  { %v1703_v42 = vadd.f32 %v1702_v19, %v893_v29 }
 0x160   :  { %v1739_v16 = vpop.f32.mrf.mxu1 }
 0x161   :  { %v1740_v34 = vadd.f32 %v1739_v16, %v1697_v30 }
 0x162   :  { %v1741_v18 = vpop.f32.mrf.mxu1 }
 0x163   :  { %v1742_v38 = vadd.f32 %v1741_v18, %v1699_v33 }
 0x164   :  { %v1743_v20 = vpop.f32.mrf.mxu1 }
 0x165   :  { %v1744_v43 = vadd.f32 %v1743_v20, %v1701_v37 }
 0x166   :  { %v1745_v25 = vpop.f32.mrf.mxu1 }
 0x167   :  { %v1746_v48 = vadd.f32 %v1745_v25, %v1703_v42  ;;  %v4664_v42 = vld [vmem:[%s6142_s3 + $0x270] ss:$8 sps:$4 sm:$0xff]  }
 0x198   :  { %v1782_v23 = vpop.f32.mrf.mxu0 }
 0x199   :  { %v1783_v39 = vadd.f32 %v1782_v23, %v1740_v34 }
 0x19a   :  { %v1784_v27 = vpop.f32.mrf.mxu0 }
 0x19b   :  { %v1785_v44 = vadd.f32 %v1784_v27, %v1742_v38 }
 0x19c   :  { %v1786_v31 = vpop.f32.mrf.mxu0 }
 0x19d   :  { %v1787_v49 = vadd.f32 %v1786_v31, %v1744_v43 }
 0x19e   :  { %v1788_v40 = vpop.f32.mrf.mxu0 }
 0x19f   :  { %v1789_v54 = vadd.f32 %v1788_v40, %v1746_v48 }
 0x1a1   :  { %v1825_v28 = vpop.f32.mrf.mxu1 }
 0x1a2   :  { %v1826_v45 = vadd.f32 %v1825_v28, %v1783_v39 }
 0x1a3   :  { %v1827_v32 = vpop.f32.mrf.mxu1 }
 0x1a4   :  { %v1828_v50 = vadd.f32 %v1827_v32, %v1785_v44 }
 0x1a5   :  { %v1829_v41 = vpop.f32.mrf.mxu1 }
 0x1a6   :  { %v1830_v55 = vadd.f32 %v1829_v41, %v1787_v49 }
 0x1a7   :  { %v1831_v52 = vpop.f32.mrf.mxu1 }
 0x1a8   :  { %v1832_v59 = vadd.f32 %v1831_v52, %v1789_v54  ;;  %v4679_v54 = vld [vmem:[%s6142_s3 + $0x360] ss:$8 sps:$4 sm:$0xff]  }
 0x1b8   :  { %v1868_v46 = vpop.f32.mrf.mxu0 }
 0x1b9   :  { %v1869_v51 = vadd.f32 %v1868_v46, %v1826_v45  ;;  %v4671_v46 = vld [vmem:[%s6142_s3 + $0x370] ss:$8 sps:$4 sm:$0xff]  }
 0x1ba   :  { %v1870_v53 = vpop.f32.mrf.mxu0 }
 0x1bb   :  { %v1871_v56 = vadd.f32 %v1870_v53, %v1828_v50  ;;  %v1877_v60 = vmax.f32 %v1869_v51, 0.0  ;;  %v4681_v50 = vld [vmem:[%s6142_s3 + $0x364] ss:$8 sps:$4 sm:$0xff]   ;;  %v4674_v51 = vld [vmem:[%s6142_s3 + $0x260] ss:$8 sps:$4 sm:$0xff]  }
 0x1bc   :  { %v1872_v58 = vpop.f32.mrf.mxu0  ;;  %v4684_v53 = vld [vmem:[%s6142_s3 + $0x254] ss:$8 sps:$4 sm:$0xff]  }
 0x1bd   :  { %v1878_v61 = vmax.f32 %v1871_v56, 0.0  ;;  %v1873_v62 = vadd.f32 %v1872_v58, %v1830_v55  ;;  %v4687_v55 = vld [vmem:[%s6142_s3 + $0x354] ss:$8 sps:$4 sm:$0xff]   ;;  %v4682_v56 = vld [vmem:[%s6142_s3 + $0x250] ss:$8 sps:$4 sm:$0xff]  }
 0x1be   :  { %v1874_v63 = vpop.f32.mrf.mxu0  ;;  %v4690_v58 = vld [vmem:[%s6142_s3 + $0x244] ss:$8 sps:$4 sm:$0xff]  }
 0x1bf   :  { %v4003_v0 = vpack.c.bf16 %v1878_v61, %v1877_v60  ;;  %v1875_v1 = vadd.f32 %v1874_v63, %v1832_v59  ;;  %v1879_v3 = vmax.f32 %v1873_v62, 0.0  ;;  %v4685_v59 = vld [vmem:[%s6142_s3 + $0x350] ss:$8 sps:$4 sm:$0xff]   ;;  %v4693_v60 = vld [vmem:[%s6142_s3 + $0x344] ss:$8 sps:$4 sm:$0xff]  }
 0x1c0   :  { %v4688_v61 = vld [vmem:[%s6142_s3 + $0x240] ss:$8 sps:$4 sm:$0xff]   ;;  %v4696_v62 = vld [vmem:[%s6142_s3 + $0x234] ss:$8 sps:$4 sm:$0xff]  }
 0x1c1   :  { %v1892_v2 = vrot.slane %v4003_v0, %v5723_v57  ;;  %v1880_v5 = vmax.f32 %v1875_v1, 0.0  ;;  %v4691_v63 = vld [vmem:[%s6142_s3 + $0x340] ss:$8 sps:$4 sm:$0xff]   ;;  %v4699_v0 = vld [vmem:[%s6142_s3 + $0x334] ss:$8 sps:$4 sm:$0xff]  }
 0x1c2   :  { %v4694_v1 = vld [vmem:[%s6142_s3 + $0x230] ss:$8 sps:$4 sm:$0xff]  }
 0x1c3   :  { %v1899_v6 = vrot.slane %v1892_v2, %v5723_v57  ;;  %4004 = vst.sshfl [vmem:[#allocation5] sm:$0x5 pattern:$0x73625140] %v1892_v2  ;;  %v1902_v7 = vcombine.high %v1892_v2, %v1892_v2  ;;  %v4006_v8 = vpack.c.bf16 %v1880_v5, %v1879_v3  ;;  %v4702_v2 = vld [vmem:[%s6142_s3 + $0x224] ss:$8 sps:$4 sm:$0xff]  }
 0x1c4   :  { %v4697_v3 = vld [vmem:[%s6142_s3 + $0x330] ss:$8 sps:$4 sm:$0xff]   ;;  %v4705_v5 = vld [vmem:[%s6142_s3 + $0x324] ss:$8 sps:$4 sm:$0xff]  }
 0x1c5   :  { %v1909_v9 = vrot.slane %v1902_v7, %v5723_v57  ;;  %4005 = vst.sshfl [vmem:[#allocation5 + $0x2] sm:$0x5 pattern:$0x73625140] %v1902_v7  ;;  %v1912_v10 = vcombine.high %v1899_v6, %v1899_v6  ;;  %v1925_v12 = vrot.slane %v4006_v8, %v5723_v57  ;;  %v4700_v6 = vld [vmem:[%s6142_s3 + $0x220] ss:$8 sps:$4 sm:$0xff]  }
 0x1c6   :  { %v4708_v7 = vld [vmem:[%s6142_s3 + $0x214] ss:$8 sps:$4 sm:$0xff]   ;;  %v4703_v8 = vld [vmem:[%s6142_s3 + $0x320] ss:$8 sps:$4 sm:$0xff]  }
 0x1c7   :  { %1914 = vst [vmem:[#allocation5 + $0x4] sm:$0x3] %v1912_v10  ;;  %v1915_v13 = vcombine.high %v1909_v9, %v1909_v9  ;;  %v1932_v14 = vrot.slane %v1925_v12, %v5723_v57  ;;  %4007 = vst.sshfl [vmem:[#allocation5 + $0x8] sm:$0x5 pattern:$0x73625140] %v1925_v12  ;;  %v1935_v15 = vcombine.high %v1925_v12, %v1925_v12 }
 0x1c8   :  { %v4711_v9 = vld [vmem:[%s6142_s3 + $0x314] ss:$8 sps:$4 sm:$0xff]   ;;  %v4706_v10 = vld [vmem:[%s6142_s3 + $0x210] ss:$8 sps:$4 sm:$0xff]   ;;  %v4714_v12 = vld [vmem:[%s6142_s3 + $0x204] ss:$8 sps:$4 sm:$0xff]  }
 0x1c9   :  { %1917 = vst [vmem:[#allocation5 + $0x6] sm:$0x3] %v1915_v13  ;;  %v1942_v16 = vrot.slane %v1935_v15, %v5723_v57  ;;  %4008 = vst.sshfl [vmem:[#allocation5 + $0xa] sm:$0x5 pattern:$0x73625140] %v1935_v15  ;;  %v1945_v17 = vcombine.high %v1932_v14, %v1932_v14 }
 0x1ca   :  { %v4709_v13 = vld [vmem:[%s6142_s3 + $0x310] ss:$8 sps:$4 sm:$0xff]   ;;  %v4717_v14 = vld [vmem:[%s6142_s3 + $0x304] ss:$8 sps:$4 sm:$0xff]   ;;  %v4712_v15 = vld [vmem:[%s6142_s3 + $0x200] ss:$8 sps:$4 sm:$0xff]  }
 0x1cb   :  { %1947 = vst [vmem:[#allocation5 + $0xc] sm:$0x3] %v1945_v17  ;;  %v1948_v18 = vcombine.high %v1942_v16, %v1942_v16  ;;  %v4720_v16 = vld [vmem:[%s6142_s3 + $0x2f4] ss:$8 sps:$4 sm:$0xff]   ;;  %v4715_v17 = vld [vmem:[%s6142_s3 + $0x300] ss:$8 sps:$4 sm:$0xff]  }
 0x1cd   :  { %1950 = vst [vmem:[#allocation5 + $0xe] sm:$0x3] %v1948_v18  ;;  %v4723_v18 = vld [vmem:[%s6142_s3 + $0x3f4] ss:$8 sps:$4 sm:$0xff]  }
 0x1d0   :  { %v1951_v19 = vld [vmem:[#allocation5] sm:$0xff] }
 0x1d1   :  { %v2006_v20 = vld [vmem:[#allocation5 + $0x4] sm:$0xff]  ;;  %v1960_v22 = vrot.slane %v1951_v19, %v4922_v11  ;;  %v1953_v25 = vcombine.high %v1951_v19, %v1951_v19 }
 0x1d2   :  { %v2015_v23 = vrot.slane %v2006_v20, %v4922_v11  ;;  %v2008_v26 = vcombine.high %v2006_v20, %v2006_v20  ;;  %v4718_v19 = vld [vmem:[%s6142_s3 + $0x2f0] ss:$8 sps:$4 sm:$0xff]   ;;  %v4726_v20 = vld [vmem:[%s6142_s3 + $0x2e4] ss:$8 sps:$4 sm:$0xff]  }
 0x1d3   :  { %4009 = vst.sshfl [vmem:[#allocation3] sm:$0x5 pattern:$0x75316420] %v1960_v22  ;;  %v1968_v28 = vcombine.high %v1960_v22, %v1960_v22  ;;  %v1967_v29 = vrot.slane %v1953_v25, %v4922_v11  ;;  %v4721_v22 = vld [vmem:[%s6142_s3 + $0x3f0] ss:$8 sps:$4 sm:$0xff]  }
 0x1d4   :  { %v2023_v27 = vcombine.low %v2015_v23, %v2015_v23  ;;  %4014 = vst.sshfl [vmem:[#allocation3 + $0x8] sm:$0x50 pattern:$0x75316420] %v2015_v23  ;;  %v2022_v30 = vrot.slane %v2008_v26, %v4922_v11  ;;  %v2061_v31 = vld [vmem:[#allocation5 + $0x8] sm:$0xff] }
 0x1d5   :  { %v2063_v32 = vcombine.low %v2061_v31, %v2061_v31  ;;  %4010 = vst.sshfl [vmem:[#allocation3 + $0x8] sm:$0x5 pattern:$0x75316420] %v1968_v28  ;;  %v2077_v34 = vrot.slane %v2061_v31, %v4922_v11  ;;  %v1969_v35 = vcombine.high %v1967_v29, %v1967_v29  ;;  %v4729_v23 = vld [vmem:[%s6142_s3 + $0x3e4] ss:$8 sps:$4 sm:$0xff]  }
 0x1d6   :  { %4013 = vst.sshfl [vmem:[#allocation3] sm:$0x50 pattern:$0x75316420] %v2023_v27  ;;  %v2024_v33 = vcombine.low %v2022_v30, %v2022_v30  ;;  %v4724_v25 = vld [vmem:[%s6142_s3 + $0x2e0] ss:$8 sps:$4 sm:$0xff]  }
 0x1d7   :  { %4011 = vst.sshfl [vmem:[#allocation3 + $0x10] sm:$0x5 pattern:$0x75316420] %v1967_v29  ;;  %v2070_v36 = vrot.slane %v2063_v32, %v4922_v11  ;;  %v2079_v37 = vcombine.high %v2077_v34, %v2077_v34  ;;  %v4732_v26 = vld [vmem:[%s6142_s3 + $0x2d4] ss:$8 sps:$4 sm:$0xff]  }
 0x1d8   :  { %4016 = vst.sshfl [vmem:[#allocation3 + $0x18] sm:$0x50 pattern:$0x75316420] %v2022_v30  ;;  %v4727_v27 = vld [vmem:[%s6142_s3 + $0x3e0] ss:$8 sps:$4 sm:$0xff]  }
 0x1d9   :  { %4015 = vst.sshfl [vmem:[#allocation3 + $0x10] sm:$0x50 pattern:$0x75316420] %v2024_v33  ;;  %v2078_v38 = vcombine.high %v2070_v36, %v2070_v36  ;;  %v4735_v28 = vld [vmem:[%s6142_s3 + $0x3d4] ss:$8 sps:$4 sm:$0xff]  }
 0x1da   :  { %4019 = vst.sshfl [vmem:[#allocation3 + $0x10] sm:$0xa pattern:$0x75316420] %v2077_v34  ;;  %v4730_v29 = vld [vmem:[%s6142_s3 + $0x2d0] ss:$8 sps:$4 sm:$0xff]  }
 0x1db   :  { %4012 = vst.sshfl [vmem:[#allocation3 + $0x18] sm:$0x5 pattern:$0x75316420] %v1969_v35  ;;  %v4738_v30 = vld [vmem:[%s6142_s3 + $0x2c4] ss:$8 sps:$4 sm:$0xff]  }
 0x1dc   :  { %4017 = vst.sshfl [vmem:[#allocation3] sm:$0xa pattern:$0x75316420] %v2070_v36  ;;  %v4733_v31 = vld [vmem:[%s6142_s3 + $0x3d0] ss:$8 sps:$4 sm:$0xff]  }
 0x1dd   :  { %4020 = vst.sshfl [vmem:[#allocation3 + $0x18] sm:$0xa pattern:$0x75316420] %v2079_v37  ;;  %v4741_v32 = vld [vmem:[%s6142_s3 + $0x3c4] ss:$8 sps:$4 sm:$0xff]  }
 0x1de   :  { %4018 = vst.sshfl [vmem:[#allocation3 + $0x8] sm:$0xa pattern:$0x75316420] %v2078_v38  ;;  %v4736_v33 = vld [vmem:[%s6142_s3 + $0x2c0] ss:$8 sps:$4 sm:$0xff]  }
 0x1df   :  { %v4744_v34 = vld [vmem:[%s6142_s3 + $0x2b4] ss:$8 sps:$4 sm:$0xff]   ;;  %v4739_v35 = vld [vmem:[%s6142_s3 + $0x3c0] ss:$8 sps:$4 sm:$0xff]   ;;  %v4742_v37 = vld [vmem:[%s6142_s3 + $0x2b0] ss:$8 sps:$4 sm:$0xff]  }
 0x1e0   :  { %v4747_v36 = vld [vmem:[%s6142_s3 + $0x3b4] ss:$8 sps:$4 sm:$0xff]   ;;  %v4750_v38 = vld [vmem:[%s6142_s3 + $0x2a4] ss:$8 sps:$4 sm:$0xff]  }
 0x1e1   :  { %v5740_v43 = vld [vmem:[#allocation3 + $0x10] sm:$0x77] }
 0x1e2   :  { %v4026_v49 = vcombine.high %v5740_v43, %v5740_v43 }
 0x1e3   :  { %v2116_v39 = vld [vmem:[#allocation3] sm:$0x77] }
 0x1e4   :  { %v4021_v40 = vcombine.low %v2116_v39, %v2116_v39  ;;  %v4022_v41 = vcombine.high %v2116_v39, %v2116_v39  ;;  %v5748_v48 = vld [vmem:[#allocation3 + $0x18] sm:$0x77]  ;;  %v4745_v39 = vld [vmem:[%s6142_s3 + $0x3b0] ss:$8 sps:$4 sm:$0xff]  }
 0x1e5   :  { %v2117_v44 = vld [vmem:[#allocation3 + $0x8] sm:$0x77]  ;;  %v4028_v52 = vcombine.high %v5748_v48, %v5748_v48 }
 0x1e6   :  { %2960 = vmatprep.mubr.bf16.mxu1 %v4022_v41  ;;  %v4023_v11 = vcombine.low %v2117_v44, %v2117_v44  ;;  %v4024_v45 = vcombine.high %v2117_v44, %v2117_v44  ;;  %v4748_v41 = vld [vmem:[%s6142_s3 + $0x2a0] ss:$8 sps:$4 sm:$0xff]  }
 0x1e7   :  { %2961 = vmatmul.mubr.bf16.vlgmr.msra.gmra.mxu1 %v4021_v40  ;;  %v4753_v40 = vld [vmem:[%s6142_s3 + $0x3a4] ss:$8 sps:$4 sm:$0xff]   ;;  %v4751_v44 = vld [vmem:[%s6142_s3 + $0x3a0] ss:$8 sps:$4 sm:$0xff]  }
 0x1e8   :  { %3011 = vmatpush1.bf16.msra.mxu1 %v4664_v42  ;;  %3001 = vmatprep.mubr.bf16.mxu0 %v4024_v45  ;;  %v4756_v42 = vld [vmem:[%s6142_s3 + $0x294] ss:$8 sps:$4 sm:$0xff]   ;;  %v4754_v45 = vld [vmem:[%s6142_s3 + $0x290] ss:$8 sps:$4 sm:$0xff]  }
 0x1e9   :  { %3042 = vmatprep.mubr.bf16.mxu1 %v4026_v49  ;;  %3002 = vmatmul.mubr.bf16.vlgmr.msra.gmra.mxu0 %v4023_v11  ;;  %v4759_v11 = vld [vmem:[%s6142_s3 + $0x394] ss:$8 sps:$4 sm:$0xff]   ;;  %v4765_v49 = vld [vmem:[%s6142_s3 + $0x384] ss:$8 sps:$4 sm:$0xff]  }
 0x1ea   :  { %3052 = vmatpush1.bf16.msra.mxu0 %v4671_v46  ;;  %3012 = vmatprep.subr.bf16.mxu1 %v4676_v47  ;;  %v4762_v46 = vld [vmem:[%s6142_s3 + $0x284] ss:$8 sps:$4 sm:$0xff]   ;;  %v4757_v47 = vld [vmem:[%s6142_s3 + $0x390] ss:$8 sps:$4 sm:$0xff]  }
 0x1eb   :  { %3083 = vmatprep.mubr.bf16.mxu0 %v4028_v52  ;;  %3053 = vmatprep.subr.bf16.mxu0 %v4681_v50  ;;  %v4760_v50 = vld [vmem:[%s6142_s3 + $0x280] ss:$8 sps:$4 sm:$0xff]   ;;  %v4025_v52 = vcombine.low %v5740_v43, %v5740_v43  ;;  %v4769_v43 = vld [vmem:[%s6144_s5 + $0x70] sm:$0xff]  }
 0x1ec   :  { %3013 = vmatpush1.bf16.msra.mxu1 %v4674_v51  ;;  %v4763_v51 = vld [vmem:[%s6142_s3 + $0x380] ss:$8 sps:$4 sm:$0xff]  }
 0x1ed   :  { %3014 = vmatprep.subr.bf16.mxu1 %v4684_v53  ;;  %v4027_v53 = vcombine.low %v5748_v48, %v5748_v48  ;;  %v4770_v48 = vld [vmem:[%s6144_s5 + $0xb8] sm:$0xff]  }
 0x1ee   :  { %3054 = vmatpush1.bf16.msra.mxu0 %v4679_v54  ;;  %v4766_v54 = vld [vmem:[%s6144_s5 + $0x78] sm:$0xff]  }
 0x1ef   :  { %3055 = vmatprep.subr.bf16.mxu0 %v4687_v55  ;;  %v4767_v55 = vld [vmem:[%s6144_s5 + $0x38] sm:$0xff]  }
 0x1f0   :  { %3015 = vmatpush1.bf16.msra.mxu1 %v4682_v56  ;;  %v4768_v56 = vld [vmem:[%s6144_s5 + $0xf8] sm:$0xff]  }
 0x1f1   :  { %3016 = vmatprep.subr.bf16.mxu1 %v4690_v58  ;;  %v4771_v58 = vld [vmem:[%s6144_s5 + $0x30] sm:$0xff]  }
 0x1f2   :  { %3056 = vmatpush1.bf16.msra.mxu0 %v4685_v59 }
 0x1f3   :  { %3057 = vmatprep.subr.bf16.mxu0 %v4693_v60 }
 0x1f4   :  { %3017 = vmatpush1.bf16.msra.mxu1 %v4688_v61 }
 0x1f5   :  { %3018 = vmatprep.subr.bf16.mxu1 %v4696_v62 }
 0x1f6   :  { %3058 = vmatpush1.bf16.msra.mxu0 %v4691_v63 }
 0x1f7   :  { %3059 = vmatprep.subr.bf16.mxu0 %v4699_v0 }
 0x1f8   :  { %3019 = vmatpush1.bf16.msra.mxu1 %v4694_v1 }
 0x1f9   :  { %3020 = vmatprep.subr.bf16.mxu1 %v4702_v2 }
 0x1fa   :  { %3060 = vmatpush1.bf16.msra.mxu0 %v4697_v3  ;;  %v2248_v3 = vld [vmem:[%s6143_s4] sm:$0x3] }
 0x1fb   :  { %3061 = vmatprep.subr.bf16.mxu0 %v4705_v5  ;;  %v2253_v5 = vrot.slane %v2248_v3, %v888_v21  ;;  %v4773_v21 = vld [vmem:[%s6144_s5 + $0x68] sm:$0xff]  }
 0x1fc   :  { %3021 = vmatpush1.bf16.msra.mxu1 %v4700_v6  ;;  %v2257_v6 = vrot.slane %v2248_v3, %v892_v24 }
 0x1fd   :  { %3022 = vmatprep.subr.bf16.mxu1 %v4708_v7 }
 0x1fe   :  { %3062 = vmatpush1.bf16.msra.mxu0 %v4703_v8 }
 0x1ff   :  { %3063 = vmatprep.subr.bf16.mxu0 %v4711_v9 }
 0x200   :  { %3023 = vmatpush1.bf16.msra.mxu1 %v4706_v10 }
 0x201   :  { %3024 = vmatprep.subr.bf16.mxu1 %v4714_v12 }
 0x202   :  { %3064 = vmatpush1.bf16.msra.mxu0 %v4709_v13 }
 0x203   :  { %3065 = vmatprep.subr.bf16.mxu0 %v4717_v14 }
 0x204   :  { %3025 = vmatpush1.bf16.msra.mxu1 %v4712_v15 }
 0x205   :  { %3026 = vmatprep.subr.bf16.mxu1 %v4720_v16  ;;  %v4772_v16 = vld [vmem:[%s6144_s5 + $0xf0] sm:$0xff]  }
 0x206   :  { %3066 = vmatpush1.bf16.msra.mxu0 %v4715_v17 }
 0x207   :  { %3067 = vmatprep.subr.bf16.mxu0 %v4723_v18 }
 0x208   :  { %3027 = vmatpush2.bf16.msra.mxu1 %v4718_v19 }
 0x209   :  { %3028 = vmatprep.subr.bf16.mxu1 %v4726_v20  ;;  %v4775_v20 = vld [vmem:[%s6144_s5 + $0x28] sm:$0xff]  }
 0x20a   :  { %3068 = vmatpush2.bf16.msra.mxu0 %v4721_v22 }
 0x20b   :  { %3069 = vmatprep.subr.bf16.mxu0 %v4729_v23 }
 0x20c   :  { %3029 = vmatpush2.bf16.msra.mxu1 %v4724_v25 }
 0x20d   :  { %3030 = vmatprep.subr.bf16.mxu1 %v4732_v26  ;;  %v4776_v26 = vld [vmem:[%s6144_s5 + $0xe8] sm:$0xff]  }
 0x20e   :  { %3070 = vmatpush2.bf16.msra.mxu0 %v4727_v27 }
 0x20f   :  { %3071 = vmatprep.subr.bf16.mxu0 %v4735_v28 }
 0x210   :  { %3031 = vmatpush2.bf16.msra.mxu1 %v4730_v29  ;;  %v4777_v29 = vld [vmem:[%s6144_s5 + $0x60] sm:$0xff]  }
 0x211   :  { %3032 = vmatprep.subr.bf16.mxu1 %v4738_v30  ;;  %v4778_v30 = vld [vmem:[%s6144_s5 + $0xa8] sm:$0xff]  }
 0x212   :  { %3072 = vmatpush2.bf16.msra.mxu0 %v4733_v31 }
 0x213   :  { %3073 = vmatprep.subr.bf16.mxu0 %v4741_v32  ;;  %v4779_v32 = vld [vmem:[%s6144_s5 + $0x20] sm:$0xff]  }
 0x214   :  { %3033 = vmatpush2.bf16.msra.mxu1 %v4736_v33 }
 0x215   :  { %3034 = vmatprep.subr.bf16.mxu1 %v4744_v34  ;;  %v4780_v34 = vld [vmem:[%s6144_s5 + $0xe0] sm:$0xff]  }
 0x216   :  { %3074 = vmatpush2.bf16.msra.mxu0 %v4739_v35 }
 0x217   :  { %3075 = vmatprep.subr.bf16.mxu0 %v4747_v36  ;;  %v4781_v36 = vld [vmem:[%s6144_s5 + $0x58] sm:$0xff]  }
 0x218   :  { %3035 = vmatpush2.bf16.msra.mxu1 %v4742_v37  ;;  %v4782_v37 = vld [vmem:[%s6144_s5 + $0xa0] sm:$0xff]  }
 0x219   :  { %3036 = vmatprep.subr.bf16.mxu1 %v4750_v38 }
 0x21a   :  { %3076 = vmatpush2.bf16.msra.mxu0 %v4745_v39  ;;  %v4783_v39 = vld [vmem:[%s6144_s5 + $0x18] sm:$0xff]  }
 0x21b   :  { %3077 = vmatprep.subr.bf16.mxu0 %v4753_v40 }
 0x21c   :  { %3037 = vmatpush2.bf16.msra.mxu1 %v4748_v41 }
 0x21d   :  { %3038 = vmatprep.subr.bf16.mxu1 %v4756_v42  ;;  %v4784_v42 = vld [vmem:[%s6144_s5 + $0xd8] sm:$0xff]  }
 0x21e   :  { %3078 = vmatpush2.bf16.msra.mxu0 %v4751_v44 }
 0x21f   :  { %3079 = vmatprep.subr.bf16.mxu0 %v4759_v11 }
 0x220   :  { %3039 = vmatpush2.bf16.msra.mxu1 %v4754_v45  ;;  %v4785_v45 = vld [vmem:[%s6144_s5 + $0x50] sm:$0xff]  }
 0x221   :  { %3040 = vmatprep.subr.bf16.mxu1 %v4762_v46  ;;  %v4786_v46 = vld [vmem:[%s6144_s5 + $0x98] sm:$0xff]  }
 0x222   :  { %3080 = vmatpush2.bf16.msra.mxu0 %v4757_v47  ;;  %v4787_v47 = vld [vmem:[%s6144_s5 + $0x10] sm:$0xff]  }
 0x223   :  { %3081 = vmatprep.subr.bf16.mxu0 %v4765_v49  ;;  %v4788_v49 = vld [vmem:[%s6144_s5 + $0xd0] sm:$0xff]  }
 0x224   :  { %3041 = vmatpush2.bf16.msra.mxu1 %v4760_v50  ;;  %v4789_v50 = vld [vmem:[%s6144_s5 + $0x48] sm:$0xff]  }
 0x225   :  { %4211 = vmatprep.subr.bf16.mxu1 %v4766_v54  ;;  %v4793_v54 = vld [vmem:[%s6144_s5 + $0x40] sm:$0xff]  }
 0x226   :  { %3082 = vmatpush2.bf16.msra.mxu0 %v4763_v51  ;;  %v4790_v51 = vld [vmem:[%s6144_s5 + $0x90] sm:$0xff]  }
 0x227   :  { %3043 = vmatmul.mubr.bf16.vlgmr.msra.gmra.mxu1 %v4025_v52  ;;  %4233 = vmatprep.subr.bf16.mxu0 %v4768_v56  ;;  %v4791_v52 = vld [vmem:[%s6144_s5 + $0x8] sm:$0xff]   ;;  %v4795_v56 = vld [vmem:[%s6144_s5] sm:$0xff]  }
 0x228   :  { %4212 = vmatpush3.bf16.msra.mxu1 %v4767_v55  ;;  %v4794_v55 = vld [vmem:[%s6144_s5 + $0x88] sm:$0xff]  }
 0x229   :  { %3084 = vmatmul.mubr.bf16.vlgmr.msra.gmra.mxu0 %v4027_v53  ;;  %4213 = vmatprep.subr.bf16.mxu1 %v4769_v43  ;;  %v4792_v53 = vld [vmem:[%s6144_s5 + $0xc8] sm:$0xff]   ;;  %v4796_v43 = vld [vmem:[%s6144_s5 + $0xc0] sm:$0xff]  }
 0x22a   :  { %4234 = vmatpush3.bf16.msra.mxu0 %v4770_v48  ;;  %v4798_v48 = vld [vmem:[%s6144_s5 + $0x80] sm:$0xff]  }
 0x22b   :  { %4235 = vmatprep.subr.bf16.mxu0 %v4772_v16  ;;  %v4804_v16 = vld [vmem:[%s6146_s7 + $0x10] sm:$0xff]  }
 0x22c   :  { %4214 = vmatpush3.bf16.msra.mxu1 %v4771_v58  ;;  %v4841_v58 = vmov 0.0  }
 0x22d   :  { %4215 = vmatprep.subr.bf16.mxu1 %v4773_v21  ;;  %v4808_v21 = vld [vmem:[%s6148_s9 + $0x30] sm:$0xff]  }
 0x22e   :  { %4236 = vmatpush3.bf16.msra.mxu0 %v4774_v4  ;;  %v4809_v4 = vld [vmem:[%s6148_s9 + $0x28] sm:$0xff]  }
 0x22f   :  { %4237 = vmatprep.subr.bf16.mxu0 %v4776_v26 }
 0x230   :  { %4216 = vmatpush3.bf16.msra.mxu1 %v4775_v20  ;;  %v4812_v20 = vld [vmem:[%s6148_s9 + $0x10] sm:$0xff]  }
 0x231   :  { %4217 = vmatprep.subr.bf16.mxu1 %v4777_v29 }
 0x232   :  { %4238 = vmatpush3.bf16.msra.mxu0 %v4778_v30 }
 0x233   :  { %4239 = vmatprep.subr.bf16.mxu0 %v4780_v34 }
 0x234   :  { %4218 = vmatpush3.bf16.msra.mxu1 %v4779_v32 }
 0x235   :  { %4219 = vmatprep.subr.bf16.mxu1 %v4781_v36 }
 0x236   :  { %4240 = vmatpush3.bf16.msra.mxu0 %v4782_v37 }
 0x237   :  { %4241 = vmatprep.subr.bf16.mxu0 %v4784_v42 }
 0x238   :  { %4220 = vmatpush3.bf16.msra.mxu1 %v4783_v39 }
 0x239   :  { %4221 = vmatprep.subr.bf16.mxu1 %v4785_v45  ;;  %v4814_v45 = vld [vmem:[%s6148_s9] sm:$0xff]  }
 0x23a   :  { %4242 = vmatpush3.bf16.msra.mxu0 %v4786_v46  ;;  %v4196_v46 = vld [vmem:[%s6147_s8] ss:$0 sm:$0xff]  ;;  %s4815_s8 = scalar_lea.vmem %s3819_s18, 32 }
 0x23b   :  { %4243 = vmatprep.subr.bf16.mxu0 %v4788_v49  ;;  %p4816_p0 = scmp.ne.s32.totalorder %s3819_s18, %s4815_s8  ;;  %p4821_p2 = scmp.lt.s32.totalorder %s4815_s8, %s4815_s8 }
 0x23c   :  { %4222 = vmatpush3.bf16.msra.mxu1 %v4787_v47 }
 0x23d   :  { %4223 = vmatprep.subr.bf16.mxu1 %v4789_v50  ;;  %p4822_p3 = por %p4821_p2, %p4820_p1 }
 0x23e   :  { %4244 = vmatpush3.bf16.msra.mxu0 %v4790_v51 }
 0x23f   :  { %4245 = vmatprep.subr.bf16.mxu0 %v4792_v53  ;;  %p4823_p4 = pnand %p4822_p3, %p4816_p0 }
 0x240   :  { %4224 = vmatpush3.bf16.msra.mxu1 %v4791_v52 }
 0x241   :  { %4225 = vmatprep.subr.bf16.mxu1 %v4793_v54 }
 0x242   :  { %4246 = vmatpush3.bf16.msra.mxu0 %v4794_v55  ;;  %v4202_v55 = vld [vmem:[%s6149_s10] ss:$0 sm:$0xff] }
 0x243   :  { %4247 = vmatprep.subr.bf16.mxu0 %v4796_v43 }
 0x244   :  { %4226 = vmatpush3.bf16.msra.mxu1 %v4795_v56 }
 0x245   :  { %4274 = vmatprep.subr.bf16.mxu1 %v4841_v58 }
 0x246   :  { %4248 = vmatpush3.bf16.msra.mxu0 %v4798_v48 }
 0x247   :  { %4298 = vmatprep.subr.bf16.mxu0 %v4841_v58 }
 0x2a7   :  { %v2962_v59 = vpop.f32.mrf.mxu1 }
 0x2a8   :  { %v2963_v7 = vadd.f32 %v2962_v59, %v2253_v5  ;;  %v4799_v5 = vld [vmem:[%s6144_s5 + $0x118] sm:$0xff]  }
 0x2a9   :  { %v2964_v60 = vpop.f32.mrf.mxu1  ;;  %v3003_v61 = vpop.f32.mrf.mxu0 }
 0x2aa   :  { %v2965_v8 = vadd.f32 %v2964_v60, %v2257_v6  ;;  %v3004_v9 = vadd.f32 %v3003_v61, %v2963_v7 }
 0x2ab   :  { %v2966_v62 = vpop.f32.mrf.mxu1  ;;  %v3005_v63 = vpop.f32.mrf.mxu0 }
 0x2ac   :  { %v3006_v12 = vadd.f32 %v3005_v63, %v2965_v8  ;;  %v4800_v8 = vld [vmem:[%s6144_s5 + $0x110] sm:$0xff]  }
 0x2ad   :  { %v2967_v0 = vpop.f32.mrf.mxu1  ;;  %v3007_v1 = vpop.f32.mrf.mxu0 }
 0x2af   :  { %v3008_v2 = vpop.f32.mrf.mxu0 }
 0x2e7   :  { %v3044_v10 = vpop.f32.mrf.mxu1 }
 0x2e8   :  { %v3045_v13 = vadd.f32 %v3044_v10, %v3004_v9  ;;  %v4801_v9 = vld [vmem:[%s6144_s5 + $0x108] sm:$0xff]  }
 0x2e9   :  { %v3046_v14 = vpop.f32.mrf.mxu1  ;;  %v3085_v15 = vpop.f32.mrf.mxu0 }
 0x2ea   :  { %v3047_v17 = vadd.f32 %v3046_v14, %v3006_v12  ;;  %v3086_v18 = vadd.f32 %v3085_v15, %v3045_v13  ;;  %v4802_v12 = vld [vmem:[%s6144_s5 + $0x100] sm:$0xff]   ;;  %v4803_v15 = vld [vmem:[%s6146_s7 + $0x18] sm:$0xff]  }
 0x2eb   :  { %v3048_v24 = vpop.f32.mrf.mxu1  ;;  %v3087_v19 = vpop.f32.mrf.mxu0 }
 0x2ec   :  { %v3088_v22 = vadd.f32 %v3087_v19, %v3047_v17  ;;  %v3092_v27 = vmax.f32 %v3086_v18, 0.0  ;;  %v4806_v17 = vld [vmem:[%s6146_s7] sm:$0xff]   ;;  %v4807_v18 = vld [vmem:[%s6148_s9 + $0x38] sm:$0xff]  }
 0x2ed   :  { %v3049_v23 = vpop.f32.mrf.mxu1  ;;  %v3089_v25 = vpop.f32.mrf.mxu0  ;;  %v4810_v24 = vld [vmem:[%s6148_s9 + $0x20] sm:$0xff]   ;;  %v4811_v19 = vld [vmem:[%s6148_s9 + $0x18] sm:$0xff]  }
 0x2ee   :  { %v3093_v28 = vmax.f32 %v3088_v22, 0.0 }
 0x2ef   :  { %v3090_v31 = vpop.f32.mrf.mxu0 }
 0x2f0   :  { %v4157_v33 = vpack.c.bf16 %v3093_v28, %v3092_v27  ;;  %v4158_v31 = vld [vmem:[%s6145_s6] ss:$0 sm:$0xff] }
 0x2f2   :  { %v3105_v35 = vrot.slane %v4157_v33, %v5723_v57 }
 0x2f4   :  { %v3112_v40 = vrot.slane %v3105_v35, %v5723_v57  ;;  %v3118_v41 = vcombine.high %v3105_v35, %v3105_v35 }
 0x2f6   :  { %v3135_v44 = vcombine.high %v3112_v40, %v3112_v40  ;;  %v3125_v11 = vrot.slane %v3118_v41, %v5723_v57  ;;  %3117 = vst.msk [vmem:[#allocation6] sm:$0x3] %vm5995_vm4, %v3112_v40 }
 0x2f8   :  { %3126 = vrot.lane.b32.xlu0 %v3125_v11, %s4838_s20  ;;  %3137 = vst.msk [vmem:[#allocation6 + $0x3] sm:$0x3] %vm5995_vm4, %v3135_v44  ;;  %v4813_v11 = vld [vmem:[%s6148_s9 + $0x8] sm:$0xff]  }
 0x36a   :  { %v3127_v59 = vpop.permute.xlu0 %3126 }
 0x36b   :  { %v3128_v60 = vrot.slane %v3127_v59, 7 }
 0x36d   :  { %v3129_v61 = vsel %vm194_vm1, %v3128_v60, %v3127_v59 }
 0x36e   :  { %3134 = vst.msk [vmem:[#allocation6 + $0x1] sm:$0x3] %vm3133_vm9, %v3129_v61 }
 0x375   :  { %v3138_v62 = vld [vmem:[#allocation6] sm:$0x1f] }
 0x376   :  { %3146 = vst.msk [vmem:[#allocation4] sm:$0x1f] %vm3145_vm14, %v3138_v62 }
 0x37d   :  { %v3147_v63 = vld [vmem:[#allocation4] sm:$0x1f] }
 0x37e   :  { %v3235_v0 = vrot.slane %v3147_v63, %v5723_v57  ;;  %v3228_v10 = vcombine.high %v3147_v63, %v3147_v63 }
 0x380   :  { %v3243_v1 = vcombine.high %v3235_v0, %v3235_v0  ;;  %v3250_v2 = vrot.slane %v3235_v0, %v5723_v57  ;;  %v3242_v13 = vrot.slane %v3228_v10, %v5723_v57 }
 0x382   :  { %v3264_v3 = vrot.slane %v3243_v1, %v5723_v57  ;;  %v3265_v7 = vcombine.high %v3250_v2, %v3250_v2  ;;  %v3257_v14 = vrot.slane %v3242_v13, %v5723_v57  ;;  %v4805_v57 = vld [vmem:[%s6146_s7 + $0x8] sm:$0xff]  }
 0x384   :  { %3523 = vmatprep.mubr.bf16.mxu1 %v3264_v3  ;;  %v3266_v6 = vcombine.high %v3264_v3, %v3264_v3 }
 0x385   :  { %3524 = vmatmul.mubr.bf16.vlgmr.msra.gmra.mxu1 %v3250_v2 }
 0x386   :  { %4275 = vmatpush3.bf16.msra.mxu1 %v4799_v5  ;;  %3563 = vmatprep.mubr.bf16.mxu0 %v3266_v6 }
 0x387   :  { %3564 = vmatmul.mubr.bf16.vlgmr.msra.gmra.mxu0 %v3265_v7  ;;  %4276 = vmatprep.subr.bf16.mxu1 %v4841_v58 }
 0x388   :  { %4282 = vmatprep.mubr.msk.bf16.mxu1 %vm4842_vm15, %v4841_v58  ;;  %4314 = vmatprep.mubr.msk.bf16.mxu0 %vm4842_vm15, %v4841_v58 }
 0x389   :  { %4299 = vmatpush3.bf16.msra.mxu0 %v4807_v18 }
 0x38a   :  { %4277 = vmatpush3.bf16.msra.mxu1 %v4800_v8  ;;  %4300 = vmatprep.subr.bf16.mxu0 %v4841_v58 }
 0x38b   :  { %4278 = vmatprep.subr.bf16.mxu1 %v4841_v58 }
 0x38d   :  { %4301 = vmatpush3.bf16.msra.mxu0 %v4808_v21 }
 0x38e   :  { %4279 = vmatpush3.bf16.msra.mxu1 %v4801_v9  ;;  %4302 = vmatprep.subr.bf16.mxu0 %v4841_v58 }
 0x38f   :  { %4280 = vmatprep.subr.bf16.mxu1 %v4841_v58 }
 0x391   :  { %4303 = vmatpush3.bf16.msra.mxu0 %v4809_v4 }
 0x392   :  { %4281 = vmatpush3.bf16.msra.mxu1 %v4802_v12  ;;  %4304 = vmatprep.subr.bf16.mxu0 %v4841_v58 }
 0x393   :  { %4286 = vmatprep.subr.bf16.mxu1 %v4841_v58 }
 0x395   :  { %4283 = vmatmul.mubr.msk.bf16.vlgmr.msra.gmra.mxu1 %vm194_vm1, %v3257_v14  ;;  %4305 = vmatpush3.bf16.msra.mxu0 %v4810_v24 }
 0x396   :  { %4294 = vmatprep.mubr.msk.bf16.mxu1 %vm4842_vm15, %v4841_v58  ;;  %4287 = vmatpush3.bf16.msra.mxu1 %v4803_v15 }
 0x397   :  { %4288 = vmatprep.subr.bf16.mxu1 %v4841_v58  ;;  %4306 = vmatprep.subr.bf16.mxu0 %v4841_v58 }
 0x399   :  { %4307 = vmatpush3.bf16.msra.mxu0 %v4811_v19 }
 0x39a   :  { %4289 = vmatpush3.bf16.msra.mxu1 %v4804_v16  ;;  %4308 = vmatprep.subr.bf16.mxu0 %v4841_v58 }
 0x39b   :  { %4290 = vmatprep.subr.bf16.mxu1 %v4841_v58 }
 0x39d   :  { %4309 = vmatpush3.bf16.msra.mxu0 %v4812_v20 }
 0x39e   :  { %4291 = vmatpush3.bf16.msra.mxu1 %v4805_v57  ;;  %4310 = vmatprep.subr.bf16.mxu0 %v4841_v58 }
 0x39f   :  { %4292 = vmatprep.subr.bf16.mxu1 %v4841_v58 }
 0x3a1   :  { %4311 = vmatpush3.bf16.msra.mxu0 %v4813_v11 }
 0x3a2   :  { %4293 = vmatpush3.bf16.msra.mxu1 %v4806_v17  ;;  %4312 = vmatprep.subr.bf16.mxu0 %v4841_v58 }
 0x3a5   :  { %4313 = vmatpush3.bf16.msra.mxu0 %v4814_v45 }
 0x445   :  { %v4227_v22 = vpop.f32.mrf.mxu1 }
 0x447   :  { %v4228_v23 = vpop.f32.mrf.mxu1  ;;  %v4249_v25 = vpop.f32.mrf.mxu0 }
 0x448   :  { %v4229_v30 = vadd.f32 %v4228_v23, %v4227_v22 }
 0x449   :  { %v4230_v26 = vpop.f32.mrf.mxu1  ;;  %v4250_v27 = vpop.f32.mrf.mxu0 }
 0x44a   :  { %v3526_v33 = vadd.f32 %v4229_v30, %v4158_v31  ;;  %v4251_v34 = vadd.f32 %v4250_v27, %v4249_v25 }
 0x44b   :  { %v4231_v28 = vpop.f32.mrf.mxu1  ;;  %v4252_v29 = vpop.f32.mrf.mxu0 }
 0x44c   :  { %v3566_v35 = vadd.f32 %v4251_v34, %v3526_v33 }
 0x44d   :  { %v4253_v32 = vpop.f32.mrf.mxu0 }
 0x455   :  { %v3605_v36 = vpop.f32.mrf.mxu1 }
 0x456   :  { %v3606_v37 = vadd.f32 %v3605_v36, %v3566_v35 }
 0x457   :  { %v4284_v38 = vpop.f32.mrf.mxu1 }
 0x458   :  { %v3611_v39 = vmax.f32 %v3606_v37, 0.0 }
 0x459   :  { %v3608_v40 = vpop.f32.mrf.mxu1 }
 0x45a   :  { %v3612_v41 = vpack.c.bf16 %v3611_v39, %v3611_v39 }
 0x45b   :  { %v4285_v42 = vpop.f32.mrf.mxu1 }
 0x45c   :  { %3614 = vst.msk [vmem:[#allocation7] sm:$0x1] %vm3613_vm0, %v3612_v41 }
 0x463   :  { %v3615_v44 = vld [vmem:[#allocation7] sm:$0x1] }
 0x464   :  { %4295 = vmatmul.mubr.msk.bf16.vlgmr.msra.gmra.mxu1 %vm194_vm1, %v3615_v44 }
 0x524   :  { %v3692_v47 = vpop.f32.mrf.mxu1 }
 0x525   :  { %v3693_v49 = vadd.f32 %v4196_v46, %v3692_v47 }
 0x526   :  { %v4296_v50 = vpop.f32.mrf.mxu1 }
 0x527   :  { %v3698_v51 = vmax.f32 %v3693_v49, 0.0 }
 0x528   :  { %v3695_v52 = vpop.f32.mrf.mxu1 }
 0x529   :  { %v3699_v53 = vpack.c.bf16 %v3698_v51, %v3698_v51 }
 0x52a   :  { %v4297_v54 = vpop.f32.mrf.mxu1 }
 0x52b   :  { %4315 = vmatmul.mubr.bf16.vlgmr.msra.gmra.mxu0 %v3699_v53 }
 0x5eb   :  { %v3805_v56 = vpop.f32.mrf.mxu0 }
 0x5ec   :  { %v3806_v43 = vadd.f32 %v4202_v55, %v3805_v56 }
 0x5ed   :  { %v4316_v48 = vpop.f32.mrf.mxu0 }
 0x5ee   :  { %3811 = vst [vmem:[#allocation8] sm:$0x3] %v3806_v43 }
 0x5ef   :  { %v3808_v58 = vpop.f32.mrf.mxu0 }
 0x5f0   :  { %4826 = shalt.err (!%p4823_p4)
}
 0x5f1   :  { %3821 = dma.vmem_to_hbm [thread:$0]  %s3819_s18, 32, %s6150_s11, [#allocation9]   ;;  %v4317_v59 = vpop.f32.mrf.mxu0 }
 0x5f2   :  { %4835 = dma.done.wait [#allocation9], 32  }
 0x5f3   :  { %4836 = vsyncadd [#allocation9], 4294967264 }
 0x5f4   :  { %3825 = vsyncpa [#allocation9], 1 }

</bundles_post_ra>
